<compile_context>
chip_gen: v6e
topology: v6e:2x2x1
jax: 0.10.0
libtpu: 0.0.40
codegen_flags: <defaults>
</compile_context>

<pallas_src>
import functools

import jax
import jax.numpy as jnp
from jax.experimental import pallas as pl
from jax.experimental.pallas import tpu as pltpu

# ------------------------- "cfg" constants (synthetic) -----------------------
SCALE_FACTOR = 2.0
SCALE_FACTOR_A = 2.0
IOU_THRESHOLD_LOSS = 0.5
FOCAL_GAMMA = 2.0
FOCAL_ALPHA = 1.0
SL1_BETA = 1.0 / 9.0
EPS = 1e-8
# TODO(synk): cfg.TRAIN['IOU_TYPE'] fixed to 'GIOU' (CIOU branch not emitted).


# ----------------------------- in-kernel helpers -----------------------------
def _smooth_l1(x, t):
    n = jnp.abs(x - t)
    return jnp.where(n < SL1_BETA, (0.5 / SL1_BETA) * n * n, n - 0.5 * SL1_BETA)


def _bce_with_logits(x, z):
    # numerically-stable BCEWithLogits(reduction='none')
    return jnp.maximum(x, 0.0) - x * z + jnp.log1p(jnp.exp(-jnp.abs(x)))


# --------------------------------- kernel ------------------------------------
def _loss_layer_kernel(p_ref, pd_ref, lab_ref, bb_ref, out_ref, *,
                       img_size, m_total, n_boxes, tile_rows):
    # p_ref   : (1+nC, TR, 128) conf / cls logits                        (VMEM)
    # pd_ref  : (9,    TR, 128) decoded xywh | a1..a4 | r                (VMEM)
    # lab_ref : (CL,   TR, 128) xywh | a | r | s13 | s24 | obj|mix|cls   (VMEM)
    # bb_ref  : (B, N*5)        per-box [x1,y1,x2,y2,area]               (SMEM)
    # out_ref : (6, 8, 128)     per-batch running partial sums           (VMEM)
    b = pl.program_id(0)
    t = pl.program_id(1)
    TR = tile_rows

    @pl.when(t == 0)
    def _():
        out_ref[...] = jnp.zeros_like(out_ref)

    # valid-lane mask for the zero-padded tail of the flattened spatial axis.
    row_ids = jax.lax.broadcasted_iota(jnp.int32, (TR, 128), 0)
    lane_ids = jax.lax.broadcasted_iota(jnp.int32, (TR, 128), 1)
    flat_idx = (t * TR + row_ids) * 128 + lane_ids
    valid = flat_idx < m_total

    pdx = pd_ref[0]
    pdy = pd_ref[1]
    pdw = pd_ref[2]
    pdh = pd_ref[3]
    pd_a = pd_ref[4:8]                       # (4, TR, 128)
    pdr = pd_ref[8]

    p_conf = p_ref[0]
    p_cls = p_ref[1:]                        # (nC, TR, 128)

    lx = lab_ref[0]
    ly = lab_ref[1]
    lw = lab_ref[2]
    lh = lab_ref[3]
    lab_a = lab_ref[4:8]                     # (4, TR, 128)
    lr = lab_ref[8]
    ls13 = lab_ref[9]
    ls24 = lab_ref[10]
    obj = lab_ref[11]
    mix = lab_ref[12]
    lab_cls = lab_ref[13:]                   # (nC, TR, 128)

    # raw corners of the decoded prediction (reused for GIoU and gt-IoU).
    qx1 = pdx - pdw * 0.5
    qy1 = pdy - pdh * 0.5
    qx2 = pdx + pdw * 0.5
    qy2 = pdy + pdh * 0.5

    # ---------------- GIoU(pred_xywh, label_xywh) ----------------
    p_x1 = jnp.minimum(qx1, qx2)
    p_x2 = jnp.maximum(qx1, qx2)
    p_y1 = jnp.minimum(qy1, qy2)
    p_y2 = jnp.maximum(qy1, qy2)

    lx1r = lx - lw * 0.5
    ly1r = ly - lh * 0.5
    lx2r = lx + lw * 0.5
    ly2r = ly + lh * 0.5
    l_x1 = jnp.minimum(lx1r, lx2r)
    l_x2 = jnp.maximum(lx1r, lx2r)
    l_y1 = jnp.minimum(ly1r, ly2r)
    l_y2 = jnp.maximum(ly1r, ly2r)

    area_p = (p_x2 - p_x1) * (p_y2 - p_y1)
    area_l = (l_x2 - l_x1) * (l_y2 - l_y1)
    inter = (jnp.maximum(jnp.minimum(p_x2, l_x2) - jnp.maximum(p_x1, l_x1), 0.0)
             * jnp.maximum(jnp.minimum(p_y2, l_y2) - jnp.maximum(p_y1, l_y1), 0.0))
    union = area_p + area_l - inter
    iou_pl = inter / (union + EPS)
    enclose = (jnp.maximum(jnp.maximum(p_x2, l_x2) - jnp.minimum(p_x1, l_x1), 0.0)
               * jnp.maximum(jnp.maximum(p_y2, l_y2) - jnp.minimum(p_y1, l_y1), 0.0))
    giou = iou_pl - (enclose - union) / (enclose + EPS)

    inv_img2 = 1.0 / (img_size * img_size)
    wh_scale = lw * lh * inv_img2
    bbox_loss_scale = SCALE_FACTOR - (SCALE_FACTOR - 1.0) * wh_scale
    obj_mix = obj * mix
    loss_iou = obj_mix * bbox_loss_scale * (1.0 - giou)

    # ---------------- rotation / a-offset smooth-L1 ----------------
    loss_r = obj_mix * _smooth_l1(pdr, lr) * 16.0

    a_loss_scale = 1.0 + (SCALE_FACTOR_A - 1.0) * wh_scale
    loss_a = jnp.sum(_smooth_l1(pd_a, lab_a), axis=0) * obj_mix * a_loss_scale

    # ---------------- s13 / s24 side-ratio loss ----------------
    pa1 = pd_a[0]
    pa2 = pd_a[1]
    pa3 = pd_a[2]
    pa4 = pd_a[3]
    d13 = pdw * jnp.abs(1.0 - pa1 - pa3)
    s13 = pdh * jax.lax.rsqrt(d13 * d13 + pdh * pdh + EPS)
    d24 = pdh * jnp.abs(1.0 - pa2 - pa4)
    s24 = pdw * jax.lax.rsqrt(d24 * d24 + pdw * pdw + EPS)
    s_term = (_smooth_l1(s13, ls13) / (ls13 + 1e-8)
              + _smooth_l1(s24, ls24) / (ls24 + 1e-8))
    loss_s = obj_mix * s_term

    # ---- noobj mask: all gt-IoUs below threshold (cross-multiplied test) ----
    # iou_n < thr  <=>  inter_n * (1 + thr) < thr * (area_q + area_n)
    # (exact for union > 0, no reciprocal / no approx error near the threshold)
    area_q = pdw * pdh
    thr = IOU_THRESHOLD_LOSS
    all_below = jnp.ones((TR, 128), dtype=jnp.bool_)
    for n in range(n_boxes):                 # N is small & static: unrolled
        base = 5 * n
        bx1 = bb_ref[b, base + 0]
        by1 = bb_ref[b, base + 1]
        bx2 = bb_ref[b, base + 2]
        by2 = bb_ref[b, base + 3]
        b_area = bb_ref[b, base + 4]
        jinter = (jnp.maximum(jnp.minimum(qx2, bx2) - jnp.maximum(qx1, bx1), 0.0)
                  * jnp.maximum(jnp.minimum(qy2, by2) - jnp.maximum(qy1, by1), 0.0))
        below_n = jinter * (1.0 + thr) < thr * (area_q + b_area)
        all_below = jnp.logical_and(all_below, below_n)

    # ----------- focal confidence loss (shared exp for BCE + sigmoid) -----------
    noobj = (1.0 - obj) * all_below.astype(jnp.float32)
    e = jnp.exp(-jnp.abs(p_conf))
    bce_conf = jnp.maximum(p_conf, 0.0) - p_conf * obj + jnp.log1p(e)
    inv_1pe = 1.0 / (1.0 + e)
    sig = jnp.where(p_conf >= 0.0, inv_1pe, e * inv_1pe)
    ad = jnp.abs(obj - sig)
    focal = bce_conf * (FOCAL_ALPHA * ad * ad)           # gamma == 2
    loss_conf = (obj + noobj) * focal * mix

    # ---------------- classification BCE ----------------
    loss_cls = jnp.sum(_bce_with_logits(p_cls, lab_cls), axis=0) * obj_mix

    # ---- accumulate per-batch partial sums: mask padded lanes, fold rows ----
    def _fold(x):
        if TR == 8:
            return x
        return jnp.sum(x.reshape(TR // 8, 8, 128), axis=0)

    out_ref[0] += _fold(jnp.where(valid, loss_iou, 0.0))
    out_ref[1] += _fold(jnp.where(valid, loss_conf, 0.0))
    out_ref[2] += _fold(jnp.where(valid, loss_cls, 0.0))
    out_ref[3] += _fold(jnp.where(valid, loss_a, 0.0))
    out_ref[4] += _fold(jnp.where(valid, loss_r, 0.0))
    out_ref[5] += _fold(jnp.where(valid, loss_s, 0.0))


# --------------------------------- wrapper -----------------------------------
def cal_loss_per_layer(p, p_d, label, bboxes, stride, *, tile_rows=64):
    """p:(B,G,G,A,10+nC)  p_d:(B,G,G,A,9)  label:(B,G,G,A,13+nC)  bboxes:(B,N,4)."""
    B, G = p.shape[0], p.shape[1]
    Cd = p_d.shape[-1]
    CL = label.shape[-1]
    N = bboxes.shape[1]
    A = p.shape[3]
    M = G * G * A
    img_size = float(stride * G)

    # channels 0..8 of p are never read by the loss -> drop before relayout.
    p_cc = p[..., 9:]
    Cpc = p_cc.shape[-1]                     # 1 (conf) + nC

    # Tile sizing: TR sublane-rows of 128 lanes per grid step, clamped so small
    # layers don't over-pad; default 64 keeps per-step traffic ~1-2 MB.
    R = pl.cdiv(M, 128)
    TR = min(tile_rows, ((R + 7) // 8) * 8)
    TR = max(8, (TR // 8) * 8)
    T = pl.cdiv(R, TR)
    R_pad = T * TR
    M_pad = R_pad * 128

    def relayout(x, C):
        # [B, G, G, A, C] -> [B, C, R_pad, 128]: channel-major, spatial packed
        # sublane/lane dense, zero-padded tail (masked in-kernel).
        # TODO(synk): fuse this transpose into the head that produces p/p_d
        # (emit channel-major directly) to avoid the extra HBM round trip.
        x = jnp.transpose(x.reshape(B, M, C), (0, 2, 1)).astype(jnp.float32)
        x = jnp.pad(x, ((0, 0), (0, 0), (0, M_pad - M)))
        return x.reshape(B, C, R_pad, 128)

    p_t = relayout(p_cc, Cpc)
    pd_t = relayout(p_d, Cd)
    lab_t = relayout(label, CL)

    # Precompute gt-box corners / areas so the kernel only does scalar SMEM
    # reads broadcast into vector ops: [x1, y1, x2, y2, area] per box.
    bb = bboxes.astype(jnp.float32)
    bxy, bwh = bb[..., 0:2], bb[..., 2:4]
    bb_feat = jnp.concatenate(
        [bxy - bwh * 0.5, bxy + bwh * 0.5,
         bwh[..., 0:1] * bwh[..., 1:2]], axis=-1)           # (B, N, 5)
    bb_flat = bb_feat.reshape(B, N * 5)

    kernel = functools.partial(_loss_layer_kernel, img_size=img_size,
                               m_total=M, n_boxes=N, tile_rows=TR)

    partials = pl.pallas_call(
        kernel,
        out_shape=jax.ShapeDtypeStruct((B, 6, 8, 128), jnp.float32),
        grid_spec=pltpu.PrefetchScalarGridSpec(
            num_scalar_prefetch=0,
            grid=(B, T),
            in_specs=[
                pl.BlockSpec((None, Cpc, TR, 128), lambda b, t: (b, 0, t, 0)),
                pl.BlockSpec((None, Cd, TR, 128), lambda b, t: (b, 0, t, 0)),
                pl.BlockSpec((None, CL, TR, 128), lambda b, t: (b, 0, t, 0)),
                pl.BlockSpec(memory_space=pltpu.MemorySpace.SMEM),
            ],
            # output block index depends only on b -> resident accumulator
            # across the t axis (init under pl.when(t == 0) in the kernel).
            out_specs=pl.BlockSpec((None, 6, 8, 128),
                                   lambda b, t: (b, 0, 0, 0)),
        ),
        compiler_params=pltpu.CompilerParams(
            dimension_semantics=("parallel", "arbitrary"),
            vmem_limit_bytes=32 * 1024 * 1024),   # blocks sized for v5e/v7x too
    )(p_t, pd_t, lab_t, bb_flat)

    sums = jnp.sum(partials, axis=(0, 2, 3)) / B              # (6,)
    s_iou, s_conf, s_cls = sums[0], sums[1], sums[2]
    s_a, s_r, s_s = sums[3], sums[4], sums[5]
    loss = s_iou + (s_a + s_r) + s_conf + s_cls + s_s
    return loss, s_iou, s_conf, s_cls, s_a, s_r, s_s


def loss_forward(p, p_d, label_sbbox, label_mbbox, label_lbbox,
                 sbboxes, mbboxes, lbboxes, strides):
    r_s = cal_loss_per_layer(p[0], p_d[0], label_sbbox, sbboxes, strides[0])
    r_m = cal_loss_per_layer(p[1], p_d[1], label_mbbox, mbboxes, strides[1])
    r_l = cal_loss_per_layer(p[2], p_d[2], label_lbbox, lbboxes, strides[2])
    loss = r_l[0] + r_m[0] + r_s[0]
    loss_iou = r_s[1] + r_m[1] + r_l[1]
    loss_conf = r_s[2] + r_m[2] + r_l[2]
    loss_cls = r_s[3] + r_m[3] + r_l[3]
    loss_a = r_s[4] + r_m[4] + r_l[4]
    loss_r = r_s[5] + r_m[5] + r_l[5]
    loss_s = r_s[6] + r_m[6] + r_l[6]
    return loss, loss_iou, loss_conf, loss_cls, loss_a, loss_r, loss_s


# ----------------------------------- main ------------------------------------
if __name__ == "__main__":
    key = jax.random.PRNGKey(0)
    B, A, nC, N = 2, 3, 4, 8
    img = 64
    strides = [8, 16, 32]
    grids = [img // s for s in strides]          # [8, 4, 2]
    Cp = 10 + nC                                 # raw prediction channels
    CL = 13 + nC                                 # label channels

    def make_layer(key, G):
        ks = jax.random.split(key, 12)
        p = jax.random.normal(ks[0], (B, G, G, A, Cp), jnp.float32)
        # decoded prediction: xy in [0,img], wh positive, a in (0,1), r in (0,1)
        xy = jax.random.uniform(ks[1], (B, G, G, A, 2), minval=0.0, maxval=img)
        wh = jax.random.uniform(ks[2], (B, G, G, A, 2), minval=2.0, maxval=img / 2)
        a4 = jax.random.uniform(ks[3], (B, G, G, A, 4), minval=0.05, maxval=0.95)
        r1 = jax.random.uniform(ks[4], (B, G, G, A, 1), minval=0.0, maxval=1.0)
        p_d = jnp.concatenate([xy, wh, a4, r1], axis=-1)
        # label: xywh | a4 | r | s13 | s24 | obj | mix | cls
        lxy = jax.random.uniform(ks[5], (B, G, G, A, 2), minval=0.0, maxval=img)
        lwh = jax.random.uniform(ks[6], (B, G, G, A, 2), minval=2.0, maxval=img / 2)
        la4 = jax.random.uniform(ks[7], (B, G, G, A, 4), minval=0.05, maxval=0.95)
        lr_s = jax.random.uniform(ks[8], (B, G, G, A, 3), minval=0.1, maxval=1.0)
        obj = (jax.random.uniform(ks[9], (B, G, G, A, 1)) > 0.7).astype(jnp.float32)
        mix = jax.random.uniform(ks[10], (B, G, G, A, 1), minval=0.5, maxval=1.0)
        cls = (jax.random.uniform(ks[11], (B, G, G, A, nC)) > 0.75).astype(jnp.float32)
        label = jnp.concatenate([lxy, lwh, la4, lr_s, obj, mix, cls], axis=-1)
        return p, p_d, label

    keys = jax.random.split(key, 7)
    p_s, pd_s, lab_s = make_layer(keys[0], grids[0])
    p_m, pd_m, lab_m = make_layer(keys[1], grids[1])
    p_l, pd_l, lab_l = make_layer(keys[2], grids[2])

    def make_bboxes(k):
        k1, k2 = jax.random.split(k)
        xy = jax.random.uniform(k1, (B, N, 2), minval=0.0, maxval=img)
        wh = jax.random.uniform(k2, (B, N, 2), minval=2.0, maxval=img / 2)
        return jnp.concatenate([xy, wh], axis=-1)

    sbboxes = make_bboxes(keys[3])
    mbboxes = make_bboxes(keys[4])
    lbboxes = make_bboxes(keys[5])

    out = loss_forward((p_s, p_m, p_l), (pd_s, pd_m, pd_l),
                       lab_s, lab_m, lab_l, sbboxes, mbboxes, lbboxes, strides)
    out = jax.block_until_ready(out)
    print("KERNEL_OK")
</pallas_src>

<mosaic_0001>
module attributes {stable_mosaic.version = 11 : i64} {
  func.func @_loss_layer_kernel(%arg0: i32, %arg1: i32, %arg2: memref<1x5x8x128xf32, #tpu.memory_space<vmem>>, %arg3: memref<1x9x8x128xf32, #tpu.memory_space<vmem>>, %arg4: memref<1x17x8x128xf32, #tpu.memory_space<vmem>>, %arg5: memref<2x40xf32, #tpu.memory_space<smem>>, %arg6: memref<1x6x8x128xf32, #tpu.memory_space<vmem>>) attributes {dimension_semantics = [#tpu.dimension_semantics<parallel>, #tpu.dimension_semantics<arbitrary>], iteration_bounds = array<i64: 2, 1>, scalar_prefetch = 0 : i64, scratch_operands = 0 : i64, tpu.core_type = #tpu.core_type<tc>, window_params = [{transform_indices = @transform_0, window_bounds = array<i64: 1, 5, 8, 128>}, {transform_indices = @transform_1, window_bounds = array<i64: 1, 9, 8, 128>}, {transform_indices = @transform_2, window_bounds = array<i64: 1, 17, 8, 128>}, {transform_indices = @transform_3, window_bounds = array<i64: 2, 40>}, {transform_indices = @transform_4, window_bounds = array<i64: 1, 6, 8, 128>}]} {
    %c0_i32 = arith.constant 0 : i32
    %0 = arith.cmpi eq, %arg1, %c0_i32 : i32
    %1 = arith.extui %0 : i1 to i32
    %c0_i32_0 = arith.constant 0 : i32
    %2 = arith.cmpi ne, %1, %c0_i32_0 : i32
    scf.if %2 {
      %cst_212 = arith.constant 0.000000e+00 : f32
      %581 = vector.broadcast %cst_212 : f32 to vector<6x8x128xf32>
      %c0_213 = arith.constant 0 : index
      %c0_214 = arith.constant 0 : index
      %c0_215 = arith.constant 0 : index
      %c0_216 = arith.constant 0 : index
      %582 = vector.load %arg6[%c0_213, %c0_214, %c0_215, %c0_216] : memref<1x6x8x128xf32, #tpu.memory_space<vmem>>, vector<1x6x8x128xf32>
      %583 = vector.shape_cast %582 : vector<1x6x8x128xf32> to vector<6x8x128xf32>
      %584 = vector.shape_cast %581 : vector<6x8x128xf32> to vector<1x6x8x128xf32>
      tpu.vector_store %arg6[%c0_213, %c0_214, %c0_215, %c0_216], %584 {strides = array<i32>} : memref<1x6x8x128xf32, #tpu.memory_space<vmem>>, vector<1x6x8x128xf32>,
    } else {
    }
    %3 = tpu.iota {dimensions = array<i32: 0>} : vector<8x128xi32>
    %4 = tpu.iota {dimensions = array<i32: 1>} : vector<8x128xi32>
    %c8_i32 = arith.constant 8 : i32
    %5 = arith.muli %arg1, %c8_i32 : i32
    %6 = vector.broadcast %5 : i32 to vector<8x128xi32>
    %7 = arith.addi %6, %3 : vector<8x128xi32>
    %c128_i32 = arith.constant 128 : i32
    %8 = vector.broadcast %c128_i32 : i32 to vector<8x128xi32>
    %9 = arith.muli %7, %8 : vector<8x128xi32>
    %10 = arith.addi %9, %4 : vector<8x128xi32>
    %c192_i32 = arith.constant 192 : i32
    %11 = vector.broadcast %c192_i32 : i32 to vector<8x128xi32>
    %12 = arith.cmpi slt, %10, %11 : vector<8x128xi32>
    %c0 = arith.constant 0 : index
    %c0_1 = arith.constant 0 : index
    %c0_2 = arith.constant 0 : index
    %c0_3 = arith.constant 0 : index
    %13 = vector.load %arg3[%c0, %c0_1, %c0_2, %c0_3] : memref<1x9x8x128xf32, #tpu.memory_space<vmem>>, vector<1x1x8x128xf32>
    %14 = vector.shape_cast %13 : vector<1x1x8x128xf32> to vector<8x128xf32>
    %c0_4 = arith.constant 0 : index
    %c1 = arith.constant 1 : index
    %c0_5 = arith.constant 0 : index
    %c0_6 = arith.constant 0 : index
    %15 = vector.load %arg3[%c0_4, %c1, %c0_5, %c0_6] : memref<1x9x8x128xf32, #tpu.memory_space<vmem>>, vector<1x1x8x128xf32>
    %16 = vector.shape_cast %15 : vector<1x1x8x128xf32> to vector<8x128xf32>
    %c0_7 = arith.constant 0 : index
    %c2 = arith.constant 2 : index
    %c0_8 = arith.constant 0 : index
    %c0_9 = arith.constant 0 : index
    %17 = vector.load %arg3[%c0_7, %c2, %c0_8, %c0_9] : memref<1x9x8x128xf32, #tpu.memory_space<vmem>>, vector<1x1x8x128xf32>
    %18 = vector.shape_cast %17 : vector<1x1x8x128xf32> to vector<8x128xf32>
    %c0_10 = arith.constant 0 : index
    %c3 = arith.constant 3 : index
    %c0_11 = arith.constant 0 : index
    %c0_12 = arith.constant 0 : index
    %19 = vector.load %arg3[%c0_10, %c3, %c0_11, %c0_12] : memref<1x9x8x128xf32, #tpu.memory_space<vmem>>, vector<1x1x8x128xf32>
    %20 = vector.shape_cast %19 : vector<1x1x8x128xf32> to vector<8x128xf32>
    %c0_13 = arith.constant 0 : index
    %c4 = arith.constant 4 : index
    %c0_14 = arith.constant 0 : index
    %c0_15 = arith.constant 0 : index
    %21 = vector.load %arg3[%c0_13, %c4, %c0_14, %c0_15] : memref<1x9x8x128xf32, #tpu.memory_space<vmem>>, vector<1x4x8x128xf32>
    %22 = vector.shape_cast %21 : vector<1x4x8x128xf32> to vector<4x8x128xf32>
    %c0_16 = arith.constant 0 : index
    %c8 = arith.constant 8 : index
    %c0_17 = arith.constant 0 : index
    %c0_18 = arith.constant 0 : index
    %23 = vector.load %arg3[%c0_16, %c8, %c0_17, %c0_18] : memref<1x9x8x128xf32, #tpu.memory_space<vmem>>, vector<1x1x8x128xf32>
    %24 = vector.shape_cast %23 : vector<1x1x8x128xf32> to vector<8x128xf32>
    %c0_19 = arith.constant 0 : index
    %c0_20 = arith.constant 0 : index
    %c0_21 = arith.constant 0 : index
    %c0_22 = arith.constant 0 : index
    %25 = vector.load %arg2[%c0_19, %c0_20, %c0_21, %c0_22] : memref<1x5x8x128xf32, #tpu.memory_space<vmem>>, vector<1x1x8x128xf32>
    %26 = vector.shape_cast %25 : vector<1x1x8x128xf32> to vector<8x128xf32>
    %c0_23 = arith.constant 0 : index
    %c1_24 = arith.constant 1 : index
    %c0_25 = arith.constant 0 : index
    %c0_26 = arith.constant 0 : index
    %27 = vector.load %arg2[%c0_23, %c1_24, %c0_25, %c0_26] : memref<1x5x8x128xf32, #tpu.memory_space<vmem>>, vector<1x4x8x128xf32>
    %28 = vector.shape_cast %27 : vector<1x4x8x128xf32> to vector<4x8x128xf32>
    %c0_27 = arith.constant 0 : index
    %c0_28 = arith.constant 0 : index
    %c0_29 = arith.constant 0 : index
    %c0_30 = arith.constant 0 : index
    %29 = vector.load %arg4[%c0_27, %c0_28, %c0_29, %c0_30] : memref<1x17x8x128xf32, #tpu.memory_space<vmem>>, vector<1x1x8x128xf32>
    %30 = vector.shape_cast %29 : vector<1x1x8x128xf32> to vector<8x128xf32>
    %c0_31 = arith.constant 0 : index
    %c1_32 = arith.constant 1 : index
    %c0_33 = arith.constant 0 : index
    %c0_34 = arith.constant 0 : index
    %31 = vector.load %arg4[%c0_31, %c1_32, %c0_33, %c0_34] : memref<1x17x8x128xf32, #tpu.memory_space<vmem>>, vector<1x1x8x128xf32>
    %32 = vector.shape_cast %31 : vector<1x1x8x128xf32> to vector<8x128xf32>
    %c0_35 = arith.constant 0 : index
    %c2_36 = arith.constant 2 : index
    %c0_37 = arith.constant 0 : index
    %c0_38 = arith.constant 0 : index
    %33 = vector.load %arg4[%c0_35, %c2_36, %c0_37, %c0_38] : memref<1x17x8x128xf32, #tpu.memory_space<vmem>>, vector<1x1x8x128xf32>
    %34 = vector.shape_cast %33 : vector<1x1x8x128xf32> to vector<8x128xf32>
    %c0_39 = arith.constant 0 : index
    %c3_40 = arith.constant 3 : index
    %c0_41 = arith.constant 0 : index
    %c0_42 = arith.constant 0 : index
    %35 = vector.load %arg4[%c0_39, %c3_40, %c0_41, %c0_42] : memref<1x17x8x128xf32, #tpu.memory_space<vmem>>, vector<1x1x8x128xf32>
    %36 = vector.shape_cast %35 : vector<1x1x8x128xf32> to vector<8x128xf32>
    %c0_43 = arith.constant 0 : index
    %c4_44 = arith.constant 4 : index
    %c0_45 = arith.constant 0 : index
    %c0_46 = arith.constant 0 : index
    %37 = vector.load %arg4[%c0_43, %c4_44, %c0_45, %c0_46] : memref<1x17x8x128xf32, #tpu.memory_space<vmem>>, vector<1x4x8x128xf32>
    %38 = vector.shape_cast %37 : vector<1x4x8x128xf32> to vector<4x8x128xf32>
    %c0_47 = arith.constant 0 : index
    %c8_48 = arith.constant 8 : index
    %c0_49 = arith.constant 0 : index
    %c0_50 = arith.constant 0 : index
    %39 = vector.load %arg4[%c0_47, %c8_48, %c0_49, %c0_50] : memref<1x17x8x128xf32, #tpu.memory_space<vmem>>, vector<1x1x8x128xf32>
    %40 = vector.shape_cast %39 : vector<1x1x8x128xf32> to vector<8x128xf32>
    %c0_51 = arith.constant 0 : index
    %c9 = arith.constant 9 : index
    %c0_52 = arith.constant 0 : index
    %c0_53 = arith.constant 0 : index
    %41 = vector.load %arg4[%c0_51, %c9, %c0_52, %c0_53] : memref<1x17x8x128xf32, #tpu.memory_space<vmem>>, vector<1x1x8x128xf32>
    %42 = vector.shape_cast %41 : vector<1x1x8x128xf32> to vector<8x128xf32>
    %c0_54 = arith.constant 0 : index
    %c10 = arith.constant 10 : index
    %c0_55 = arith.constant 0 : index
    %c0_56 = arith.constant 0 : index
    %43 = vector.load %arg4[%c0_54, %c10, %c0_55, %c0_56] : memref<1x17x8x128xf32, #tpu.memory_space<vmem>>, vector<1x1x8x128xf32>
    %44 = vector.shape_cast %43 : vector<1x1x8x128xf32> to vector<8x128xf32>
    %c0_57 = arith.constant 0 : index
    %c11 = arith.constant 11 : index
    %c0_58 = arith.constant 0 : index
    %c0_59 = arith.constant 0 : index
    %45 = vector.load %arg4[%c0_57, %c11, %c0_58, %c0_59] : memref<1x17x8x128xf32, #tpu.memory_space<vmem>>, vector<1x1x8x128xf32>
    %46 = vector.shape_cast %45 : vector<1x1x8x128xf32> to vector<8x128xf32>
    %c0_60 = arith.constant 0 : index
    %c12 = arith.constant 12 : index
    %c0_61 = arith.constant 0 : index
    %c0_62 = arith.constant 0 : index
    %47 = vector.load %arg4[%c0_60, %c12, %c0_61, %c0_62] : memref<1x17x8x128xf32, #tpu.memory_space<vmem>>, vector<1x1x8x128xf32>
    %48 = vector.shape_cast %47 : vector<1x1x8x128xf32> to vector<8x128xf32>
    %c0_63 = arith.constant 0 : index
    %c13 = arith.constant 13 : index
    %c0_64 = arith.constant 0 : index
    %c0_65 = arith.constant 0 : index
    %49 = vector.load %arg4[%c0_63, %c13, %c0_64, %c0_65] : memref<1x17x8x128xf32, #tpu.memory_space<vmem>>, vector<1x4x8x128xf32>
    %50 = vector.shape_cast %49 : vector<1x4x8x128xf32> to vector<4x8x128xf32>
    %cst = arith.constant 5.000000e-01 : f32
    %51 = vector.broadcast %cst : f32 to vector<8x128xf32>
    %52 = arith.mulf %18, %51 : vector<8x128xf32>
    %53 = arith.subf %14, %52 : vector<8x128xf32>
    %cst_66 = arith.constant 5.000000e-01 : f32
    %54 = vector.broadcast %cst_66 : f32 to vector<8x128xf32>
    %55 = arith.mulf %20, %54 : vector<8x128xf32>
    %56 = arith.subf %16, %55 : vector<8x128xf32>
    %cst_67 = arith.constant 5.000000e-01 : f32
    %57 = vector.broadcast %cst_67 : f32 to vector<8x128xf32>
    %58 = arith.mulf %18, %57 : vector<8x128xf32>
    %59 = arith.addf %14, %58 : vector<8x128xf32>
    %cst_68 = arith.constant 5.000000e-01 : f32
    %60 = vector.broadcast %cst_68 : f32 to vector<8x128xf32>
    %61 = arith.mulf %20, %60 : vector<8x128xf32>
    %62 = arith.addf %16, %61 : vector<8x128xf32>
    %63 = arith.minimumf %53, %59 : vector<8x128xf32>
    %64 = arith.maximumf %53, %59 : vector<8x128xf32>
    %65 = arith.minimumf %56, %62 : vector<8x128xf32>
    %66 = arith.maximumf %56, %62 : vector<8x128xf32>
    %cst_69 = arith.constant 5.000000e-01 : f32
    %67 = vector.broadcast %cst_69 : f32 to vector<8x128xf32>
    %68 = arith.mulf %34, %67 : vector<8x128xf32>
    %69 = arith.subf %30, %68 : vector<8x128xf32>
    %cst_70 = arith.constant 5.000000e-01 : f32
    %70 = vector.broadcast %cst_70 : f32 to vector<8x128xf32>
    %71 = arith.mulf %36, %70 : vector<8x128xf32>
    %72 = arith.subf %32, %71 : vector<8x128xf32>
    %cst_71 = arith.constant 5.000000e-01 : f32
    %73 = vector.broadcast %cst_71 : f32 to vector<8x128xf32>
    %74 = arith.mulf %34, %73 : vector<8x128xf32>
    %75 = arith.addf %30, %74 : vector<8x128xf32>
    %cst_72 = arith.constant 5.000000e-01 : f32
    %76 = vector.broadcast %cst_72 : f32 to vector<8x128xf32>
    %77 = arith.mulf %36, %76 : vector<8x128xf32>
    %78 = arith.addf %32, %77 : vector<8x128xf32>
    %79 = arith.minimumf %69, %75 : vector<8x128xf32>
    %80 = arith.maximumf %69, %75 : vector<8x128xf32>
    %81 = arith.minimumf %72, %78 : vector<8x128xf32>
    %82 = arith.maximumf %72, %78 : vector<8x128xf32>
    %83 = arith.subf %64, %63 : vector<8x128xf32>
    %84 = arith.subf %66, %65 : vector<8x128xf32>
    %85 = arith.mulf %83, %84 : vector<8x128xf32>
    %86 = arith.subf %80, %79 : vector<8x128xf32>
    %87 = arith.subf %82, %81 : vector<8x128xf32>
    %88 = arith.mulf %86, %87 : vector<8x128xf32>
    %89 = arith.minimumf %64, %80 : vector<8x128xf32>
    %90 = arith.maximumf %63, %79 : vector<8x128xf32>
    %91 = arith.subf %89, %90 : vector<8x128xf32>
    %cst_73 = arith.constant 0.000000e+00 : f32
    %92 = vector.broadcast %cst_73 : f32 to vector<8x128xf32>
    %93 = arith.maximumf %91, %92 : vector<8x128xf32>
    %94 = arith.minimumf %66, %82 : vector<8x128xf32>
    %95 = arith.maximumf %65, %81 : vector<8x128xf32>
    %96 = arith.subf %94, %95 : vector<8x128xf32>
    %cst_74 = arith.constant 0.000000e+00 : f32
    %97 = vector.broadcast %cst_74 : f32 to vector<8x128xf32>
    %98 = arith.maximumf %96, %97 : vector<8x128xf32>
    %99 = arith.mulf %93, %98 : vector<8x128xf32>
    %100 = arith.addf %85, %88 : vector<8x128xf32>
    %101 = arith.subf %100, %99 : vector<8x128xf32>
    %cst_75 = arith.constant 9.99999993E-9 : f32
    %102 = vector.broadcast %cst_75 : f32 to vector<8x128xf32>
    %103 = arith.addf %101, %102 : vector<8x128xf32>
    %104 = arith.divf %99, %103 : vector<8x128xf32>
    %105 = arith.maximumf %64, %80 : vector<8x128xf32>
    %106 = arith.minimumf %63, %79 : vector<8x128xf32>
    %107 = arith.subf %105, %106 : vector<8x128xf32>
    %cst_76 = arith.constant 0.000000e+00 : f32
    %108 = vector.broadcast %cst_76 : f32 to vector<8x128xf32>
    %109 = arith.maximumf %107, %108 : vector<8x128xf32>
    %110 = arith.maximumf %66, %82 : vector<8x128xf32>
    %111 = arith.minimumf %65, %81 : vector<8x128xf32>
    %112 = arith.subf %110, %111 : vector<8x128xf32>
    %cst_77 = arith.constant 0.000000e+00 : f32
    %113 = vector.broadcast %cst_77 : f32 to vector<8x128xf32>
    %114 = arith.maximumf %112, %113 : vector<8x128xf32>
    %115 = arith.mulf %109, %114 : vector<8x128xf32>
    %116 = arith.subf %115, %101 : vector<8x128xf32>
    %cst_78 = arith.constant 9.99999993E-9 : f32
    %117 = vector.broadcast %cst_78 : f32 to vector<8x128xf32>
    %118 = arith.addf %115, %117 : vector<8x128xf32>
    %119 = arith.divf %116, %118 : vector<8x128xf32>
    %120 = arith.subf %104, %119 : vector<8x128xf32>
    %121 = arith.mulf %34, %36 : vector<8x128xf32>
    %cst_79 = arith.constant 2.44140625E-4 : f32
    %122 = vector.broadcast %cst_79 : f32 to vector<8x128xf32>
    %123 = arith.mulf %121, %122 : vector<8x128xf32>
    %cst_80 = arith.constant 1.000000e+00 : f32
    %124 = vector.broadcast %cst_80 : f32 to vector<8x128xf32>
    %125 = arith.mulf %124, %123 : vector<8x128xf32>
    %cst_81 = arith.constant 2.000000e+00 : f32
    %126 = vector.broadcast %cst_81 : f32 to vector<8x128xf32>
    %127 = arith.subf %126, %125 : vector<8x128xf32>
    %128 = arith.mulf %46, %48 : vector<8x128xf32>
    %129 = arith.mulf %128, %127 : vector<8x128xf32>
    %cst_82 = arith.constant 1.000000e+00 : f32
    %130 = vector.broadcast %cst_82 : f32 to vector<8x128xf32>
    %131 = arith.subf %130, %120 : vector<8x128xf32>
    %132 = arith.mulf %129, %131 : vector<8x128xf32>
    %133 = arith.subf %24, %40 : vector<8x128xf32>
    %134 = math.absf %133 : vector<8x128xf32>
    %cst_83 = arith.constant 0.111111112 : f32
    %135 = vector.broadcast %cst_83 : f32 to vector<8x128xf32>
    %136 = arith.cmpf olt, %134, %135 : vector<8x128xf32>
    %cst_84 = arith.constant 4.500000e+00 : f32
    %137 = vector.broadcast %cst_84 : f32 to vector<8x128xf32>
    %138 = arith.mulf %137, %134 : vector<8x128xf32>
    %139 = arith.mulf %138, %134 : vector<8x128xf32>
    %cst_85 = arith.constant 0.055555556 : f32
    %140 = vector.broadcast %cst_85 : f32 to vector<8x128xf32>
    %141 = arith.subf %134, %140 : vector<8x128xf32>
    %142 = arith.select %136, %139, %141 : vector<8x128xi1>, vector<8x128xf32>
    %143 = arith.mulf %128, %142 : vector<8x128xf32>
    %cst_86 = arith.constant 1.600000e+01 : f32
    %144 = vector.broadcast %cst_86 : f32 to vector<8x128xf32>
    %145 = arith.mulf %143, %144 : vector<8x128xf32>
    %cst_87 = arith.constant 1.000000e+00 : f32
    %146 = vector.broadcast %cst_87 : f32 to vector<8x128xf32>
    %147 = arith.mulf %146, %123 : vector<8x128xf32>
    %cst_88 = arith.constant 1.000000e+00 : f32
    %148 = vector.broadcast %cst_88 : f32 to vector<8x128xf32>
    %149 = arith.addf %148, %147 : vector<8x128xf32>
    %150 = arith.subf %22, %38 : vector<4x8x128xf32>
    %151 = math.absf %150 : vector<4x8x128xf32>
    %cst_89 = arith.constant 0.111111112 : f32
    %152 = vector.broadcast %cst_89 : f32 to vector<4x8x128xf32>
    %153 = arith.cmpf olt, %151, %152 : vector<4x8x128xf32>
    %cst_90 = arith.constant 4.500000e+00 : f32
    %154 = vector.broadcast %cst_90 : f32 to vector<4x8x128xf32>
    %155 = arith.mulf %154, %151 : vector<4x8x128xf32>
    %156 = arith.mulf %155, %151 : vector<4x8x128xf32>
    %cst_91 = arith.constant 0.055555556 : f32
    %157 = vector.broadcast %cst_91 : f32 to vector<4x8x128xf32>
    %158 = arith.subf %151, %157 : vector<4x8x128xf32>
    %159 = arith.select %153, %156, %158 : vector<4x8x128xi1>, vector<4x8x128xf32>
    %cst_92 = arith.constant dense<0.000000e+00> : vector<8x128xf32>
    %160 = vector.multi_reduction <add>, %159, %cst_92 [0] : vector<4x8x128xf32> to vector<8x128xf32>
    %161 = arith.mulf %160, %128 : vector<8x128xf32>
    %162 = arith.mulf %161, %149 : vector<8x128xf32>
    %163 = vector.extract_strided_slice %22 {offsets = [0, 0, 0], sizes = [1, 8, 128], strides = [1, 1, 1]} : vector<4x8x128xf32> to vector<1x8x128xf32>
    %164 = vector.shape_cast %163 : vector<1x8x128xf32> to vector<8x128xf32>
    %165 = vector.extract_strided_slice %22 {offsets = [1, 0, 0], sizes = [1, 8, 128], strides = [1, 1, 1]} : vector<4x8x128xf32> to vector<1x8x128xf32>
    %166 = vector.shape_cast %165 : vector<1x8x128xf32> to vector<8x128xf32>
    %167 = vector.extract_strided_slice %22 {offsets = [2, 0, 0], sizes = [1, 8, 128], strides = [1, 1, 1]} : vector<4x8x128xf32> to vector<1x8x128xf32>
    %168 = vector.shape_cast %167 : vector<1x8x128xf32> to vector<8x128xf32>
    %169 = vector.extract_strided_slice %22 {offsets = [3, 0, 0], sizes = [1, 8, 128], strides = [1, 1, 1]} : vector<4x8x128xf32> to vector<1x8x128xf32>
    %170 = vector.shape_cast %169 : vector<1x8x128xf32> to vector<8x128xf32>
    %cst_93 = arith.constant 1.000000e+00 : f32
    %171 = vector.broadcast %cst_93 : f32 to vector<8x128xf32>
    %172 = arith.subf %171, %164 : vector<8x128xf32>
    %173 = arith.subf %172, %168 : vector<8x128xf32>
    %174 = math.absf %173 : vector<8x128xf32>
    %175 = arith.mulf %18, %174 : vector<8x128xf32>
    %176 = arith.mulf %175, %175 : vector<8x128xf32>
    %177 = arith.mulf %20, %20 : vector<8x128xf32>
    %178 = arith.addf %176, %177 : vector<8x128xf32>
    %cst_94 = arith.constant 9.99999993E-9 : f32
    %179 = vector.broadcast %cst_94 : f32 to vector<8x128xf32>
    %180 = arith.addf %178, %179 : vector<8x128xf32>
    %181 = math.rsqrt %180 : vector<8x128xf32>
    %182 = arith.mulf %20, %181 : vector<8x128xf32>
    %cst_95 = arith.constant 1.000000e+00 : f32
    %183 = vector.broadcast %cst_95 : f32 to vector<8x128xf32>
    %184 = arith.subf %183, %166 : vector<8x128xf32>
    %185 = arith.subf %184, %170 : vector<8x128xf32>
    %186 = math.absf %185 : vector<8x128xf32>
    %187 = arith.mulf %20, %186 : vector<8x128xf32>
    %188 = arith.mulf %187, %187 : vector<8x128xf32>
    %189 = arith.mulf %18, %18 : vector<8x128xf32>
    %190 = arith.addf %188, %189 : vector<8x128xf32>
    %cst_96 = arith.constant 9.99999993E-9 : f32
    %191 = vector.broadcast %cst_96 : f32 to vector<8x128xf32>
    %192 = arith.addf %190, %191 : vector<8x128xf32>
    %193 = math.rsqrt %192 : vector<8x128xf32>
    %194 = arith.mulf %18, %193 : vector<8x128xf32>
    %195 = arith.subf %182, %42 : vector<8x128xf32>
    %196 = math.absf %195 : vector<8x128xf32>
    %cst_97 = arith.constant 0.111111112 : f32
    %197 = vector.broadcast %cst_97 : f32 to vector<8x128xf32>
    %198 = arith.cmpf olt, %196, %197 : vector<8x128xf32>
    %cst_98 = arith.constant 4.500000e+00 : f32
    %199 = vector.broadcast %cst_98 : f32 to vector<8x128xf32>
    %200 = arith.mulf %199, %196 : vector<8x128xf32>
    %201 = arith.mulf %200, %196 : vector<8x128xf32>
    %cst_99 = arith.constant 0.055555556 : f32
    %202 = vector.broadcast %cst_99 : f32 to vector<8x128xf32>
    %203 = arith.subf %196, %202 : vector<8x128xf32>
    %204 = arith.select %198, %201, %203 : vector<8x128xi1>, vector<8x128xf32>
    %cst_100 = arith.constant 9.99999993E-9 : f32
    %205 = vector.broadcast %cst_100 : f32 to vector<8x128xf32>
    %206 = arith.addf %42, %205 : vector<8x128xf32>
    %207 = arith.divf %204, %206 : vector<8x128xf32>
    %208 = arith.subf %194, %44 : vector<8x128xf32>
    %209 = math.absf %208 : vector<8x128xf32>
    %cst_101 = arith.constant 0.111111112 : f32
    %210 = vector.broadcast %cst_101 : f32 to vector<8x128xf32>
    %211 = arith.cmpf olt, %209, %210 : vector<8x128xf32>
    %cst_102 = arith.constant 4.500000e+00 : f32
    %212 = vector.broadcast %cst_102 : f32 to vector<8x128xf32>
    %213 = arith.mulf %212, %209 : vector<8x128xf32>
    %214 = arith.mulf %213, %209 : vector<8x128xf32>
    %cst_103 = arith.constant 0.055555556 : f32
    %215 = vector.broadcast %cst_103 : f32 to vector<8x128xf32>
    %216 = arith.subf %209, %215 : vector<8x128xf32>
    %217 = arith.select %211, %214, %216 : vector<8x128xi1>, vector<8x128xf32>
    %cst_104 = arith.constant 9.99999993E-9 : f32
    %218 = vector.broadcast %cst_104 : f32 to vector<8x128xf32>
    %219 = arith.addf %44, %218 : vector<8x128xf32>
    %220 = arith.divf %217, %219 : vector<8x128xf32>
    %221 = arith.addf %207, %220 : vector<8x128xf32>
    %222 = arith.mulf %128, %221 : vector<8x128xf32>
    %223 = arith.mulf %18, %20 : vector<8x128xf32>
    %true = arith.constant true
    %224 = vector.broadcast %true : i1 to vector<8x128xi1>
    %225 = arith.index_cast %arg0 : i32 to index
    %c0_105 = arith.constant 0 : index
    %226 = memref.load %arg5[%225, %c0_105] : memref<2x40xf32, #tpu.memory_space<smem>>
    %227 = arith.index_cast %arg0 : i32 to index
    %c1_106 = arith.constant 1 : index
    %228 = memref.load %arg5[%227, %c1_106] : memref<2x40xf32, #tpu.memory_space<smem>>
    %229 = arith.index_cast %arg0 : i32 to index
    %c2_107 = arith.constant 2 : index
    %230 = memref.load %arg5[%229, %c2_107] : memref<2x40xf32, #tpu.memory_space<smem>>
    %231 = arith.index_cast %arg0 : i32 to index
    %c3_108 = arith.constant 3 : index
    %232 = memref.load %arg5[%231, %c3_108] : memref<2x40xf32, #tpu.memory_space<smem>>
    %233 = arith.index_cast %arg0 : i32 to index
    %c4_109 = arith.constant 4 : index
    %234 = memref.load %arg5[%233, %c4_109] : memref<2x40xf32, #tpu.memory_space<smem>>
    %235 = vector.broadcast %230 : f32 to vector<8x128xf32>
    %236 = arith.minimumf %59, %235 : vector<8x128xf32>
    %237 = vector.broadcast %226 : f32 to vector<8x128xf32>
    %238 = arith.maximumf %53, %237 : vector<8x128xf32>
    %239 = arith.subf %236, %238 : vector<8x128xf32>
    %cst_110 = arith.constant 0.000000e+00 : f32
    %240 = vector.broadcast %cst_110 : f32 to vector<8x128xf32>
    %241 = arith.maximumf %239, %240 : vector<8x128xf32>
    %242 = vector.broadcast %232 : f32 to vector<8x128xf32>
    %243 = arith.minimumf %62, %242 : vector<8x128xf32>
    %244 = vector.broadcast %228 : f32 to vector<8x128xf32>
    %245 = arith.maximumf %56, %244 : vector<8x128xf32>
    %246 = arith.subf %243, %245 : vector<8x128xf32>
    %cst_111 = arith.constant 0.000000e+00 : f32
    %247 = vector.broadcast %cst_111 : f32 to vector<8x128xf32>
    %248 = arith.maximumf %246, %247 : vector<8x128xf32>
    %249 = arith.mulf %241, %248 : vector<8x128xf32>
    %cst_112 = arith.constant 1.500000e+00 : f32
    %250 = vector.broadcast %cst_112 : f32 to vector<8x128xf32>
    %251 = arith.mulf %249, %250 : vector<8x128xf32>
    %252 = vector.broadcast %234 : f32 to vector<8x128xf32>
    %253 = arith.addf %223, %252 : vector<8x128xf32>
    %cst_113 = arith.constant 5.000000e-01 : f32
    %254 = vector.broadcast %cst_113 : f32 to vector<8x128xf32>
    %255 = arith.mulf %254, %253 : vector<8x128xf32>
    %256 = arith.cmpf olt, %251, %255 : vector<8x128xf32>
    %257 = arith.andi %224, %256 : vector<8x128xi1>
    %258 = arith.index_cast %arg0 : i32 to index
    %c5 = arith.constant 5 : index
    %259 = memref.load %arg5[%258, %c5] : memref<2x40xf32, #tpu.memory_space<smem>>
    %260 = arith.index_cast %arg0 : i32 to index
    %c6 = arith.constant 6 : index
    %261 = memref.load %arg5[%260, %c6] : memref<2x40xf32, #tpu.memory_space<smem>>
    %262 = arith.index_cast %arg0 : i32 to index
    %c7 = arith.constant 7 : index
    %263 = memref.load %arg5[%262, %c7] : memref<2x40xf32, #tpu.memory_space<smem>>
    %264 = arith.index_cast %arg0 : i32 to index
    %c8_114 = arith.constant 8 : index
    %265 = memref.load %arg5[%264, %c8_114] : memref<2x40xf32, #tpu.memory_space<smem>>
    %266 = arith.index_cast %arg0 : i32 to index
    %c9_115 = arith.constant 9 : index
    %267 = memref.load %arg5[%266, %c9_115] : memref<2x40xf32, #tpu.memory_space<smem>>
    %268 = vector.broadcast %263 : f32 to vector<8x128xf32>
    %269 = arith.minimumf %59, %268 : vector<8x128xf32>
    %270 = vector.broadcast %259 : f32 to vector<8x128xf32>
    %271 = arith.maximumf %53, %270 : vector<8x128xf32>
    %272 = arith.subf %269, %271 : vector<8x128xf32>
    %cst_116 = arith.constant 0.000000e+00 : f32
    %273 = vector.broadcast %cst_116 : f32 to vector<8x128xf32>
    %274 = arith.maximumf %272, %273 : vector<8x128xf32>
    %275 = vector.broadcast %265 : f32 to vector<8x128xf32>
    %276 = arith.minimumf %62, %275 : vector<8x128xf32>
    %277 = vector.broadcast %261 : f32 to vector<8x128xf32>
    %278 = arith.maximumf %56, %277 : vector<8x128xf32>
    %279 = arith.subf %276, %278 : vector<8x128xf32>
    %cst_117 = arith.constant 0.000000e+00 : f32
    %280 = vector.broadcast %cst_117 : f32 to vector<8x128xf32>
    %281 = arith.maximumf %279, %280 : vector<8x128xf32>
    %282 = arith.mulf %274, %281 : vector<8x128xf32>
    %cst_118 = arith.constant 1.500000e+00 : f32
    %283 = vector.broadcast %cst_118 : f32 to vector<8x128xf32>
    %284 = arith.mulf %282, %283 : vector<8x128xf32>
    %285 = vector.broadcast %267 : f32 to vector<8x128xf32>
    %286 = arith.addf %223, %285 : vector<8x128xf32>
    %cst_119 = arith.constant 5.000000e-01 : f32
    %287 = vector.broadcast %cst_119 : f32 to vector<8x128xf32>
    %288 = arith.mulf %287, %286 : vector<8x128xf32>
    %289 = arith.cmpf olt, %284, %288 : vector<8x128xf32>
    %290 = arith.andi %257, %289 : vector<8x128xi1>
    %291 = arith.index_cast %arg0 : i32 to index
    %c10_120 = arith.constant 10 : index
    %292 = memref.load %arg5[%291, %c10_120] : memref<2x40xf32, #tpu.memory_space<smem>>
    %293 = arith.index_cast %arg0 : i32 to index
    %c11_121 = arith.constant 11 : index
    %294 = memref.load %arg5[%293, %c11_121] : memref<2x40xf32, #tpu.memory_space<smem>>
    %295 = arith.index_cast %arg0 : i32 to index
    %c12_122 = arith.constant 12 : index
    %296 = memref.load %arg5[%295, %c12_122] : memref<2x40xf32, #tpu.memory_space<smem>>
    %297 = arith.index_cast %arg0 : i32 to index
    %c13_123 = arith.constant 13 : index
    %298 = memref.load %arg5[%297, %c13_123] : memref<2x40xf32, #tpu.memory_space<smem>>
    %299 = arith.index_cast %arg0 : i32 to index
    %c14 = arith.constant 14 : index
    %300 = memref.load %arg5[%299, %c14] : memref<2x40xf32, #tpu.memory_space<smem>>
    %301 = vector.broadcast %296 : f32 to vector<8x128xf32>
    %302 = arith.minimumf %59, %301 : vector<8x128xf32>
    %303 = vector.broadcast %292 : f32 to vector<8x128xf32>
    %304 = arith.maximumf %53, %303 : vector<8x128xf32>
    %305 = arith.subf %302, %304 : vector<8x128xf32>
    %cst_124 = arith.constant 0.000000e+00 : f32
    %306 = vector.broadcast %cst_124 : f32 to vector<8x128xf32>
    %307 = arith.maximumf %305, %306 : vector<8x128xf32>
    %308 = vector.broadcast %298 : f32 to vector<8x128xf32>
    %309 = arith.minimumf %62, %308 : vector<8x128xf32>
    %310 = vector.broadcast %294 : f32 to vector<8x128xf32>
    %311 = arith.maximumf %56, %310 : vector<8x128xf32>
    %312 = arith.subf %309, %311 : vector<8x128xf32>
    %cst_125 = arith.constant 0.000000e+00 : f32
    %313 = vector.broadcast %cst_125 : f32 to vector<8x128xf32>
    %314 = arith.maximumf %312, %313 : vector<8x128xf32>
    %315 = arith.mulf %307, %314 : vector<8x128xf32>
    %cst_126 = arith.constant 1.500000e+00 : f32
    %316 = vector.broadcast %cst_126 : f32 to vector<8x128xf32>
    %317 = arith.mulf %315, %316 : vector<8x128xf32>
    %318 = vector.broadcast %300 : f32 to vector<8x128xf32>
    %319 = arith.addf %223, %318 : vector<8x128xf32>
    %cst_127 = arith.constant 5.000000e-01 : f32
    %320 = vector.broadcast %cst_127 : f32 to vector<8x128xf32>
    %321 = arith.mulf %320, %319 : vector<8x128xf32>
    %322 = arith.cmpf olt, %317, %321 : vector<8x128xf32>
    %323 = arith.andi %290, %322 : vector<8x128xi1>
    %324 = arith.index_cast %arg0 : i32 to index
    %c15 = arith.constant 15 : index
    %325 = memref.load %arg5[%324, %c15] : memref<2x40xf32, #tpu.memory_space<smem>>
    %326 = arith.index_cast %arg0 : i32 to index
    %c16 = arith.constant 16 : index
    %327 = memref.load %arg5[%326, %c16] : memref<2x40xf32, #tpu.memory_space<smem>>
    %328 = arith.index_cast %arg0 : i32 to index
    %c17 = arith.constant 17 : index
    %329 = memref.load %arg5[%328, %c17] : memref<2x40xf32, #tpu.memory_space<smem>>
    %330 = arith.index_cast %arg0 : i32 to index
    %c18 = arith.constant 18 : index
    %331 = memref.load %arg5[%330, %c18] : memref<2x40xf32, #tpu.memory_space<smem>>
    %332 = arith.index_cast %arg0 : i32 to index
    %c19 = arith.constant 19 : index
    %333 = memref.load %arg5[%332, %c19] : memref<2x40xf32, #tpu.memory_space<smem>>
    %334 = vector.broadcast %329 : f32 to vector<8x128xf32>
    %335 = arith.minimumf %59, %334 : vector<8x128xf32>
    %336 = vector.broadcast %325 : f32 to vector<8x128xf32>
    %337 = arith.maximumf %53, %336 : vector<8x128xf32>
    %338 = arith.subf %335, %337 : vector<8x128xf32>
    %cst_128 = arith.constant 0.000000e+00 : f32
    %339 = vector.broadcast %cst_128 : f32 to vector<8x128xf32>
    %340 = arith.maximumf %338, %339 : vector<8x128xf32>
    %341 = vector.broadcast %331 : f32 to vector<8x128xf32>
    %342 = arith.minimumf %62, %341 : vector<8x128xf32>
    %343 = vector.broadcast %327 : f32 to vector<8x128xf32>
    %344 = arith.maximumf %56, %343 : vector<8x128xf32>
    %345 = arith.subf %342, %344 : vector<8x128xf32>
    %cst_129 = arith.constant 0.000000e+00 : f32
    %346 = vector.broadcast %cst_129 : f32 to vector<8x128xf32>
    %347 = arith.maximumf %345, %346 : vector<8x128xf32>
    %348 = arith.mulf %340, %347 : vector<8x128xf32>
    %cst_130 = arith.constant 1.500000e+00 : f32
    %349 = vector.broadcast %cst_130 : f32 to vector<8x128xf32>
    %350 = arith.mulf %348, %349 : vector<8x128xf32>
    %351 = vector.broadcast %333 : f32 to vector<8x128xf32>
    %352 = arith.addf %223, %351 : vector<8x128xf32>
    %cst_131 = arith.constant 5.000000e-01 : f32
    %353 = vector.broadcast %cst_131 : f32 to vector<8x128xf32>
    %354 = arith.mulf %353, %352 : vector<8x128xf32>
    %355 = arith.cmpf olt, %350, %354 : vector<8x128xf32>
    %356 = arith.andi %323, %355 : vector<8x128xi1>
    %357 = arith.index_cast %arg0 : i32 to index
    %c20 = arith.constant 20 : index
    %358 = memref.load %arg5[%357, %c20] : memref<2x40xf32, #tpu.memory_space<smem>>
    %359 = arith.index_cast %arg0 : i32 to index
    %c21 = arith.constant 21 : index
    %360 = memref.load %arg5[%359, %c21] : memref<2x40xf32, #tpu.memory_space<smem>>
    %361 = arith.index_cast %arg0 : i32 to index
    %c22 = arith.constant 22 : index
    %362 = memref.load %arg5[%361, %c22] : memref<2x40xf32, #tpu.memory_space<smem>>
    %363 = arith.index_cast %arg0 : i32 to index
    %c23 = arith.constant 23 : index
    %364 = memref.load %arg5[%363, %c23] : memref<2x40xf32, #tpu.memory_space<smem>>
    %365 = arith.index_cast %arg0 : i32 to index
    %c24 = arith.constant 24 : index
    %366 = memref.load %arg5[%365, %c24] : memref<2x40xf32, #tpu.memory_space<smem>>
    %367 = vector.broadcast %362 : f32 to vector<8x128xf32>
    %368 = arith.minimumf %59, %367 : vector<8x128xf32>
    %369 = vector.broadcast %358 : f32 to vector<8x128xf32>
    %370 = arith.maximumf %53, %369 : vector<8x128xf32>
    %371 = arith.subf %368, %370 : vector<8x128xf32>
    %cst_132 = arith.constant 0.000000e+00 : f32
    %372 = vector.broadcast %cst_132 : f32 to vector<8x128xf32>
    %373 = arith.maximumf %371, %372 : vector<8x128xf32>
    %374 = vector.broadcast %364 : f32 to vector<8x128xf32>
    %375 = arith.minimumf %62, %374 : vector<8x128xf32>
    %376 = vector.broadcast %360 : f32 to vector<8x128xf32>
    %377 = arith.maximumf %56, %376 : vector<8x128xf32>
    %378 = arith.subf %375, %377 : vector<8x128xf32>
    %cst_133 = arith.constant 0.000000e+00 : f32
    %379 = vector.broadcast %cst_133 : f32 to vector<8x128xf32>
    %380 = arith.maximumf %378, %379 : vector<8x128xf32>
    %381 = arith.mulf %373, %380 : vector<8x128xf32>
    %cst_134 = arith.constant 1.500000e+00 : f32
    %382 = vector.broadcast %cst_134 : f32 to vector<8x128xf32>
    %383 = arith.mulf %381, %382 : vector<8x128xf32>
    %384 = vector.broadcast %366 : f32 to vector<8x128xf32>
    %385 = arith.addf %223, %384 : vector<8x128xf32>
    %cst_135 = arith.constant 5.000000e-01 : f32
    %386 = vector.broadcast %cst_135 : f32 to vector<8x128xf32>
    %387 = arith.mulf %386, %385 : vector<8x128xf32>
    %388 = arith.cmpf olt, %383, %387 : vector<8x128xf32>
    %389 = arith.andi %356, %388 : vector<8x128xi1>
    %390 = arith.index_cast %arg0 : i32 to index
    %c25 = arith.constant 25 : index
    %391 = memref.load %arg5[%390, %c25] : memref<2x40xf32, #tpu.memory_space<smem>>
    %392 = arith.index_cast %arg0 : i32 to index
    %c26 = arith.constant 26 : index
    %393 = memref.load %arg5[%392, %c26] : memref<2x40xf32, #tpu.memory_space<smem>>
    %394 = arith.index_cast %arg0 : i32 to index
    %c27 = arith.constant 27 : index
    %395 = memref.load %arg5[%394, %c27] : memref<2x40xf32, #tpu.memory_space<smem>>
    %396 = arith.index_cast %arg0 : i32 to index
    %c28 = arith.constant 28 : index
    %397 = memref.load %arg5[%396, %c28] : memref<2x40xf32, #tpu.memory_space<smem>>
    %398 = arith.index_cast %arg0 : i32 to index
    %c29 = arith.constant 29 : index
    %399 = memref.load %arg5[%398, %c29] : memref<2x40xf32, #tpu.memory_space<smem>>
    %400 = vector.broadcast %395 : f32 to vector<8x128xf32>
    %401 = arith.minimumf %59, %400 : vector<8x128xf32>
    %402 = vector.broadcast %391 : f32 to vector<8x128xf32>
    %403 = arith.maximumf %53, %402 : vector<8x128xf32>
    %404 = arith.subf %401, %403 : vector<8x128xf32>
    %cst_136 = arith.constant 0.000000e+00 : f32
    %405 = vector.broadcast %cst_136 : f32 to vector<8x128xf32>
    %406 = arith.maximumf %404, %405 : vector<8x128xf32>
    %407 = vector.broadcast %397 : f32 to vector<8x128xf32>
    %408 = arith.minimumf %62, %407 : vector<8x128xf32>
    %409 = vector.broadcast %393 : f32 to vector<8x128xf32>
    %410 = arith.maximumf %56, %409 : vector<8x128xf32>
    %411 = arith.subf %408, %410 : vector<8x128xf32>
    %cst_137 = arith.constant 0.000000e+00 : f32
    %412 = vector.broadcast %cst_137 : f32 to vector<8x128xf32>
    %413 = arith.maximumf %411, %412 : vector<8x128xf32>
    %414 = arith.mulf %406, %413 : vector<8x128xf32>
    %cst_138 = arith.constant 1.500000e+00 : f32
    %415 = vector.broadcast %cst_138 : f32 to vector<8x128xf32>
    %416 = arith.mulf %414, %415 : vector<8x128xf32>
    %417 = vector.broadcast %399 : f32 to vector<8x128xf32>
    %418 = arith.addf %223, %417 : vector<8x128xf32>
    %cst_139 = arith.constant 5.000000e-01 : f32
    %419 = vector.broadcast %cst_139 : f32 to vector<8x128xf32>
    %420 = arith.mulf %419, %418 : vector<8x128xf32>
    %421 = arith.cmpf olt, %416, %420 : vector<8x128xf32>
    %422 = arith.andi %389, %421 : vector<8x128xi1>
    %423 = arith.index_cast %arg0 : i32 to index
    %c30 = arith.constant 30 : index
    %424 = memref.load %arg5[%423, %c30] : memref<2x40xf32, #tpu.memory_space<smem>>
    %425 = arith.index_cast %arg0 : i32 to index
    %c31 = arith.constant 31 : index
    %426 = memref.load %arg5[%425, %c31] : memref<2x40xf32, #tpu.memory_space<smem>>
    %427 = arith.index_cast %arg0 : i32 to index
    %c32 = arith.constant 32 : index
    %428 = memref.load %arg5[%427, %c32] : memref<2x40xf32, #tpu.memory_space<smem>>
    %429 = arith.index_cast %arg0 : i32 to index
    %c33 = arith.constant 33 : index
    %430 = memref.load %arg5[%429, %c33] : memref<2x40xf32, #tpu.memory_space<smem>>
    %431 = arith.index_cast %arg0 : i32 to index
    %c34 = arith.constant 34 : index
    %432 = memref.load %arg5[%431, %c34] : memref<2x40xf32, #tpu.memory_space<smem>>
    %433 = vector.broadcast %428 : f32 to vector<8x128xf32>
    %434 = arith.minimumf %59, %433 : vector<8x128xf32>
    %435 = vector.broadcast %424 : f32 to vector<8x128xf32>
    %436 = arith.maximumf %53, %435 : vector<8x128xf32>
    %437 = arith.subf %434, %436 : vector<8x128xf32>
    %cst_140 = arith.constant 0.000000e+00 : f32
    %438 = vector.broadcast %cst_140 : f32 to vector<8x128xf32>
    %439 = arith.maximumf %437, %438 : vector<8x128xf32>
    %440 = vector.broadcast %430 : f32 to vector<8x128xf32>
    %441 = arith.minimumf %62, %440 : vector<8x128xf32>
    %442 = vector.broadcast %426 : f32 to vector<8x128xf32>
    %443 = arith.maximumf %56, %442 : vector<8x128xf32>
    %444 = arith.subf %441, %443 : vector<8x128xf32>
    %cst_141 = arith.constant 0.000000e+00 : f32
    %445 = vector.broadcast %cst_141 : f32 to vector<8x128xf32>
    %446 = arith.maximumf %444, %445 : vector<8x128xf32>
    %447 = arith.mulf %439, %446 : vector<8x128xf32>
    %cst_142 = arith.constant 1.500000e+00 : f32
    %448 = vector.broadcast %cst_142 : f32 to vector<8x128xf32>
    %449 = arith.mulf %447, %448 : vector<8x128xf32>
    %450 = vector.broadcast %432 : f32 to vector<8x128xf32>
    %451 = arith.addf %223, %450 : vector<8x128xf32>
    %cst_143 = arith.constant 5.000000e-01 : f32
    %452 = vector.broadcast %cst_143 : f32 to vector<8x128xf32>
    %453 = arith.mulf %452, %451 : vector<8x128xf32>
    %454 = arith.cmpf olt, %449, %453 : vector<8x128xf32>
    %455 = arith.andi %422, %454 : vector<8x128xi1>
    %456 = arith.index_cast %arg0 : i32 to index
    %c35 = arith.constant 35 : index
    %457 = memref.load %arg5[%456, %c35] : memref<2x40xf32, #tpu.memory_space<smem>>
    %458 = arith.index_cast %arg0 : i32 to index
    %c36 = arith.constant 36 : index
    %459 = memref.load %arg5[%458, %c36] : memref<2x40xf32, #tpu.memory_space<smem>>
    %460 = arith.index_cast %arg0 : i32 to index
    %c37 = arith.constant 37 : index
    %461 = memref.load %arg5[%460, %c37] : memref<2x40xf32, #tpu.memory_space<smem>>
    %462 = arith.index_cast %arg0 : i32 to index
    %c38 = arith.constant 38 : index
    %463 = memref.load %arg5[%462, %c38] : memref<2x40xf32, #tpu.memory_space<smem>>
    %464 = arith.index_cast %arg0 : i32 to index
    %c39 = arith.constant 39 : index
    %465 = memref.load %arg5[%464, %c39] : memref<2x40xf32, #tpu.memory_space<smem>>
    %466 = vector.broadcast %461 : f32 to vector<8x128xf32>
    %467 = arith.minimumf %59, %466 : vector<8x128xf32>
    %468 = vector.broadcast %457 : f32 to vector<8x128xf32>
    %469 = arith.maximumf %53, %468 : vector<8x128xf32>
    %470 = arith.subf %467, %469 : vector<8x128xf32>
    %cst_144 = arith.constant 0.000000e+00 : f32
    %471 = vector.broadcast %cst_144 : f32 to vector<8x128xf32>
    %472 = arith.maximumf %470, %471 : vector<8x128xf32>
    %473 = vector.broadcast %463 : f32 to vector<8x128xf32>
    %474 = arith.minimumf %62, %473 : vector<8x128xf32>
    %475 = vector.broadcast %459 : f32 to vector<8x128xf32>
    %476 = arith.maximumf %56, %475 : vector<8x128xf32>
    %477 = arith.subf %474, %476 : vector<8x128xf32>
    %cst_145 = arith.constant 0.000000e+00 : f32
    %478 = vector.broadcast %cst_145 : f32 to vector<8x128xf32>
    %479 = arith.maximumf %477, %478 : vector<8x128xf32>
    %480 = arith.mulf %472, %479 : vector<8x128xf32>
    %cst_146 = arith.constant 1.500000e+00 : f32
    %481 = vector.broadcast %cst_146 : f32 to vector<8x128xf32>
    %482 = arith.mulf %480, %481 : vector<8x128xf32>
    %483 = vector.broadcast %465 : f32 to vector<8x128xf32>
    %484 = arith.addf %223, %483 : vector<8x128xf32>
    %cst_147 = arith.constant 5.000000e-01 : f32
    %485 = vector.broadcast %cst_147 : f32 to vector<8x128xf32>
    %486 = arith.mulf %485, %484 : vector<8x128xf32>
    %487 = arith.cmpf olt, %482, %486 : vector<8x128xf32>
    %488 = arith.andi %455, %487 : vector<8x128xi1>
    %cst_148 = arith.constant 1.000000e+00 : f32
    %489 = vector.broadcast %cst_148 : f32 to vector<8x128xf32>
    %490 = arith.subf %489, %46 : vector<8x128xf32>
    %491 = arith.extui %488 : vector<8x128xi1> to vector<8x128xi32>
    %492 = arith.sitofp %491 : vector<8x128xi32> to vector<8x128xf32>
    %493 = arith.mulf %490, %492 : vector<8x128xf32>
    %494 = math.absf %26 : vector<8x128xf32>
    %cst_149 = arith.constant 0.000000e+00 : f32
    %495 = vector.broadcast %cst_149 : f32 to vector<8x128xf32>
    %496 = arith.subf %495, %494 : vector<8x128xf32>
    %497 = math.exp %496 : vector<8x128xf32>
    %cst_150 = arith.constant 0.000000e+00 : f32
    %498 = vector.broadcast %cst_150 : f32 to vector<8x128xf32>
    %499 = arith.maximumf %26, %498 : vector<8x128xf32>
    %500 = arith.mulf %26, %46 : vector<8x128xf32>
    %501 = arith.subf %499, %500 : vector<8x128xf32>
    %502 = math.log1p %497 : vector<8x128xf32>
    %503 = arith.addf %501, %502 : vector<8x128xf32>
    %cst_151 = arith.constant 1.000000e+00 : f32
    %504 = vector.broadcast %cst_151 : f32 to vector<8x128xf32>
    %505 = arith.addf %504, %497 : vector<8x128xf32>
    %cst_152 = arith.constant 1.000000e+00 : f32
    %506 = vector.broadcast %cst_152 : f32 to vector<8x128xf32>
    %507 = arith.divf %506, %505 : vector<8x128xf32>
    %cst_153 = arith.constant 0.000000e+00 : f32
    %508 = vector.broadcast %cst_153 : f32 to vector<8x128xf32>
    %509 = arith.cmpf oge, %26, %508 : vector<8x128xf32>
    %510 = arith.mulf %497, %507 : vector<8x128xf32>
    %511 = arith.select %509, %507, %510 : vector<8x128xi1>, vector<8x128xf32>
    %512 = arith.subf %46, %511 : vector<8x128xf32>
    %513 = math.absf %512 : vector<8x128xf32>
    %cst_154 = arith.constant 1.000000e+00 : f32
    %514 = vector.broadcast %cst_154 : f32 to vector<8x128xf32>
    %515 = arith.mulf %514, %513 : vector<8x128xf32>
    %516 = arith.mulf %515, %513 : vector<8x128xf32>
    %517 = arith.mulf %503, %516 : vector<8x128xf32>
    %518 = arith.addf %46, %493 : vector<8x128xf32>
    %519 = arith.mulf %518, %517 : vector<8x128xf32>
    %520 = arith.mulf %519, %48 : vector<8x128xf32>
    %cst_155 = arith.constant 0.000000e+00 : f32
    %521 = vector.broadcast %cst_155 : f32 to vector<4x8x128xf32>
    %522 = arith.maximumf %28, %521 : vector<4x8x128xf32>
    %523 = arith.mulf %28, %50 : vector<4x8x128xf32>
    %524 = arith.subf %522, %523 : vector<4x8x128xf32>
    %525 = math.absf %28 : vector<4x8x128xf32>
    %cst_156 = arith.constant 0.000000e+00 : f32
    %526 = vector.broadcast %cst_156 : f32 to vector<4x8x128xf32>
    %527 = arith.subf %526, %525 : vector<4x8x128xf32>
    %528 = math.exp %527 : vector<4x8x128xf32>
    %529 = math.log1p %528 : vector<4x8x128xf32>
    %530 = arith.addf %524, %529 : vector<4x8x128xf32>
    %cst_157 = arith.constant dense<0.000000e+00> : vector<8x128xf32>
    %531 = vector.multi_reduction <add>, %530, %cst_157 [0] : vector<4x8x128xf32> to vector<8x128xf32>
    %532 = arith.mulf %531, %128 : vector<8x128xf32>
    %c0_158 = arith.constant 0 : index
    %c0_159 = arith.constant 0 : index
    %c0_160 = arith.constant 0 : index
    %c0_161 = arith.constant 0 : index
    %533 = vector.load %arg6[%c0_158, %c0_159, %c0_160, %c0_161] : memref<1x6x8x128xf32, #tpu.memory_space<vmem>>, vector<1x1x8x128xf32>
    %534 = vector.shape_cast %533 : vector<1x1x8x128xf32> to vector<8x128xf32>
    %cst_162 = arith.constant 0.000000e+00 : f32
    %535 = vector.broadcast %cst_162 : f32 to vector<8x128xf32>
    %536 = arith.select %12, %132, %535 : vector<8x128xi1>, vector<8x128xf32>
    %537 = arith.addf %534, %536 : vector<8x128xf32>
    %c0_163 = arith.constant 0 : index
    %c0_164 = arith.constant 0 : index
    %c0_165 = arith.constant 0 : index
    %c0_166 = arith.constant 0 : index
    %538 = vector.load %arg6[%c0_163, %c0_164, %c0_165, %c0_166] : memref<1x6x8x128xf32, #tpu.memory_space<vmem>>, vector<1x1x8x128xf32>
    %539 = vector.shape_cast %538 : vector<1x1x8x128xf32> to vector<8x128xf32>
    %540 = vector.shape_cast %537 : vector<8x128xf32> to vector<1x1x8x128xf32>
    tpu.vector_store %arg6[%c0_163, %c0_164, %c0_165, %c0_166], %540 {strides = array<i32>} : memref<1x6x8x128xf32, #tpu.memory_space<vmem>>, vector<1x1x8x128xf32>,
    %c0_167 = arith.constant 0 : index
    %c1_168 = arith.constant 1 : index
    %c0_169 = arith.constant 0 : index
    %c0_170 = arith.constant 0 : index
    %541 = vector.load %arg6[%c0_167, %c1_168, %c0_169, %c0_170] : memref<1x6x8x128xf32, #tpu.memory_space<vmem>>, vector<1x1x8x128xf32>
    %542 = vector.shape_cast %541 : vector<1x1x8x128xf32> to vector<8x128xf32>
    %cst_171 = arith.constant 0.000000e+00 : f32
    %543 = vector.broadcast %cst_171 : f32 to vector<8x128xf32>
    %544 = arith.select %12, %520, %543 : vector<8x128xi1>, vector<8x128xf32>
    %545 = arith.addf %542, %544 : vector<8x128xf32>
    %c0_172 = arith.constant 0 : index
    %c1_173 = arith.constant 1 : index
    %c0_174 = arith.constant 0 : index
    %c0_175 = arith.constant 0 : index
    %546 = vector.load %arg6[%c0_172, %c1_173, %c0_174, %c0_175] : memref<1x6x8x128xf32, #tpu.memory_space<vmem>>, vector<1x1x8x128xf32>
    %547 = vector.shape_cast %546 : vector<1x1x8x128xf32> to vector<8x128xf32>
    %548 = vector.shape_cast %545 : vector<8x128xf32> to vector<1x1x8x128xf32>
    tpu.vector_store %arg6[%c0_172, %c1_173, %c0_174, %c0_175], %548 {strides = array<i32>} : memref<1x6x8x128xf32, #tpu.memory_space<vmem>>, vector<1x1x8x128xf32>,
    %c0_176 = arith.constant 0 : index
    %c2_177 = arith.constant 2 : index
    %c0_178 = arith.constant 0 : index
    %c0_179 = arith.constant 0 : index
    %549 = vector.load %arg6[%c0_176, %c2_177, %c0_178, %c0_179] : memref<1x6x8x128xf32, #tpu.memory_space<vmem>>, vector<1x1x8x128xf32>
    %550 = vector.shape_cast %549 : vector<1x1x8x128xf32> to vector<8x128xf32>
    %cst_180 = arith.constant 0.000000e+00 : f32
    %551 = vector.broadcast %cst_180 : f32 to vector<8x128xf32>
    %552 = arith.select %12, %532, %551 : vector<8x128xi1>, vector<8x128xf32>
    %553 = arith.addf %550, %552 : vector<8x128xf32>
    %c0_181 = arith.constant 0 : index
    %c2_182 = arith.constant 2 : index
    %c0_183 = arith.constant 0 : index
    %c0_184 = arith.constant 0 : index
    %554 = vector.load %arg6[%c0_181, %c2_182, %c0_183, %c0_184] : memref<1x6x8x128xf32, #tpu.memory_space<vmem>>, vector<1x1x8x128xf32>
    %555 = vector.shape_cast %554 : vector<1x1x8x128xf32> to vector<8x128xf32>
    %556 = vector.shape_cast %553 : vector<8x128xf32> to vector<1x1x8x128xf32>
    tpu.vector_store %arg6[%c0_181, %c2_182, %c0_183, %c0_184], %556 {strides = array<i32>} : memref<1x6x8x128xf32, #tpu.memory_space<vmem>>, vector<1x1x8x128xf32>,
    %c0_185 = arith.constant 0 : index
    %c3_186 = arith.constant 3 : index
    %c0_187 = arith.constant 0 : index
    %c0_188 = arith.constant 0 : index
    %557 = vector.load %arg6[%c0_185, %c3_186, %c0_187, %c0_188] : memref<1x6x8x128xf32, #tpu.memory_space<vmem>>, vector<1x1x8x128xf32>
    %558 = vector.shape_cast %557 : vector<1x1x8x128xf32> to vector<8x128xf32>
    %cst_189 = arith.constant 0.000000e+00 : f32
    %559 = vector.broadcast %cst_189 : f32 to vector<8x128xf32>
    %560 = arith.select %12, %162, %559 : vector<8x128xi1>, vector<8x128xf32>
    %561 = arith.addf %558, %560 : vector<8x128xf32>
    %c0_190 = arith.constant 0 : index
    %c3_191 = arith.constant 3 : index
    %c0_192 = arith.constant 0 : index
    %c0_193 = arith.constant 0 : index
    %562 = vector.load %arg6[%c0_190, %c3_191, %c0_192, %c0_193] : memref<1x6x8x128xf32, #tpu.memory_space<vmem>>, vector<1x1x8x128xf32>
    %563 = vector.shape_cast %562 : vector<1x1x8x128xf32> to vector<8x128xf32>
    %564 = vector.shape_cast %561 : vector<8x128xf32> to vector<1x1x8x128xf32>
    tpu.vector_store %arg6[%c0_190, %c3_191, %c0_192, %c0_193], %564 {strides = array<i32>} : memref<1x6x8x128xf32, #tpu.memory_space<vmem>>, vector<1x1x8x128xf32>,
    %c0_194 = arith.constant 0 : index
    %c4_195 = arith.constant 4 : index
    %c0_196 = arith.constant 0 : index
    %c0_197 = arith.constant 0 : index
    %565 = vector.load %arg6[%c0_194, %c4_195, %c0_196, %c0_197] : memref<1x6x8x128xf32, #tpu.memory_space<vmem>>, vector<1x1x8x128xf32>
    %566 = vector.shape_cast %565 : vector<1x1x8x128xf32> to vector<8x128xf32>
    %cst_198 = arith.constant 0.000000e+00 : f32
    %567 = vector.broadcast %cst_198 : f32 to vector<8x128xf32>
    %568 = arith.select %12, %145, %567 : vector<8x128xi1>, vector<8x128xf32>
    %569 = arith.addf %566, %568 : vector<8x128xf32>
    %c0_199 = arith.constant 0 : index
    %c4_200 = arith.constant 4 : index
    %c0_201 = arith.constant 0 : index
    %c0_202 = arith.constant 0 : index
    %570 = vector.load %arg6[%c0_199, %c4_200, %c0_201, %c0_202] : memref<1x6x8x128xf32, #tpu.memory_space<vmem>>, vector<1x1x8x128xf32>
    %571 = vector.shape_cast %570 : vector<1x1x8x128xf32> to vector<8x128xf32>
    %572 = vector.shape_cast %569 : vector<8x128xf32> to vector<1x1x8x128xf32>
    tpu.vector_store %arg6[%c0_199, %c4_200, %c0_201, %c0_202], %572 {strides = array<i32>} : memref<1x6x8x128xf32, #tpu.memory_space<vmem>>, vector<1x1x8x128xf32>,
    %c0_203 = arith.constant 0 : index
    %c5_204 = arith.constant 5 : index
    %c0_205 = arith.constant 0 : index
    %c0_206 = arith.constant 0 : index
    %573 = vector.load %arg6[%c0_203, %c5_204, %c0_205, %c0_206] : memref<1x6x8x128xf32, #tpu.memory_space<vmem>>, vector<1x1x8x128xf32>
    %574 = vector.shape_cast %573 : vector<1x1x8x128xf32> to vector<8x128xf32>
    %cst_207 = arith.constant 0.000000e+00 : f32
    %575 = vector.broadcast %cst_207 : f32 to vector<8x128xf32>
    %576 = arith.select %12, %222, %575 : vector<8x128xi1>, vector<8x128xf32>
    %577 = arith.addf %574, %576 : vector<8x128xf32>
    %c0_208 = arith.constant 0 : index
    %c5_209 = arith.constant 5 : index
    %c0_210 = arith.constant 0 : index
    %c0_211 = arith.constant 0 : index
    %578 = vector.load %arg6[%c0_208, %c5_209, %c0_210, %c0_211] : memref<1x6x8x128xf32, #tpu.memory_space<vmem>>, vector<1x1x8x128xf32>
    %579 = vector.shape_cast %578 : vector<1x1x8x128xf32> to vector<8x128xf32>
    %580 = vector.shape_cast %577 : vector<8x128xf32> to vector<1x1x8x128xf32>
    tpu.vector_store %arg6[%c0_208, %c5_209, %c0_210, %c0_211], %580 {strides = array<i32>} : memref<1x6x8x128xf32, #tpu.memory_space<vmem>>, vector<1x1x8x128xf32>,
    return
  }
  func.func @transform_0(%arg0: i32, %arg1: i32) -> (i32, i32, i32, i32) {
    %c0_i32 = arith.constant 0 : i32
    %c0_i32_0 = arith.constant 0 : i32
    %c0_i32_1 = arith.constant 0 : i32
    return %arg0, %c0_i32, %arg1, %c0_i32_0 : i32, i32, i32, i32
  }
  func.func @transform_1(%arg0: i32, %arg1: i32) -> (i32, i32, i32, i32) {
    %c0_i32 = arith.constant 0 : i32
    %c0_i32_0 = arith.constant 0 : i32
    %c0_i32_1 = arith.constant 0 : i32
    return %arg0, %c0_i32, %arg1, %c0_i32_0 : i32, i32, i32, i32
  }
  func.func @transform_2(%arg0: i32, %arg1: i32) -> (i32, i32, i32, i32) {
    %c0_i32 = arith.constant 0 : i32
    %c0_i32_0 = arith.constant 0 : i32
    %c0_i32_1 = arith.constant 0 : i32
    return %arg0, %c0_i32, %arg1, %c0_i32_0 : i32, i32, i32, i32
  }
  func.func @transform_3(%arg0: i32, %arg1: i32) -> (i32, i32) {
    %c0_i32 = arith.constant 0 : i32
    %c0_i32_0 = arith.constant 0 : i32
    %c0_i32_1 = arith.constant 0 : i32
    return %c0_i32, %c0_i32_0 : i32, i32
  }
  func.func @transform_4(%arg0: i32, %arg1: i32) -> (i32, i32, i32, i32) {
    %c0_i32 = arith.constant 0 : i32
    %c0_i32_0 = arith.constant 0 : i32
    %c0_i32_1 = arith.constant 0 : i32
    %c0_i32_2 = arith.constant 0 : i32
    return %arg0, %c0_i32, %c0_i32_0, %c0_i32_1 : i32, i32, i32, i32
  }
}

</mosaic_0001>

<bundles_post_ra>
// kernel: tpu_custom_call.1
= control target key start
LH: loop header
LB: loop body
LE: loop exit
PB: predicated region body
PF: predicated region fallthrough
CT: control target
= control target key end

     0   :  { %s2205_s0 = inlined_call_operand.hbm [shape: f32[2,5,8,128], index: 0, kind: input, shape index: {}]   ;;  %s2206_s1 = inlined_call_operand.hbm [shape: f32[2,9,8,128], index: 1, kind: input, shape index: {}]   ;;  %s2207_s2 = inlined_call_operand.hbm [shape: f32[2,17,8,128], index: 2, kind: input, shape index: {}]   ;;  %s2208_s3 = inlined_call_operand.vmem [shape: f32[2,40], index: 3, kind: input, shape index: {}]   ;;  %s2209_s4 = inlined_call_operand.hbm [shape: f32[2,6,8,128], index: 4, kind: output, shape index: {}]  }
   0x1   :  { %2218 = sst [smem:[#allocation18_spill]] %s2205_s0 }
   0x2   :  { %2219 = sst [smem:[#allocation19_spill]] %s2206_s1 }
   0x3   :  { %2220 = sst [smem:[#allocation20_spill]] %s2208_s3 }
   0x4   :  { %9 = vsyncpa [#allocation3], 0 }
   0x5   :  { %11 = vsyncpa [#allocation3 + $0x1], 0 }
   0x6   :  { %12 = vsyncpa [#allocation7], 0 }
   0x7   :  { %14 = vsyncpa [#allocation7 + $0x1], 0 }
   0x8   :  { %15 = vsyncpa [#allocation5], 0 }
   0x9   :  { %16 = vsyncpa [#allocation4], 0 }
   0xa   :  { %18 = vsyncpa [#allocation4 + $0x1], 0  ;;  %s1483_s15 = smov 0   ;;  %s1485_s16 = smov 0  }
   0xb   :  { %s1487_s17 = smov 0   ;;  %s1489_s18 = smov 0  }
   0xc   :  { %s1491_s19 = smov 0   ;;  %s1493_s20 = smov 0  }
   0xd LB: > { %2221 = sst [smem:[#allocation15_spill]] %s1434_s17  ;;  %s36_s21 = sadd.s32 1, %s1442_s19  ;;  %s1446_s20 = sphi %s1493_s20, %s24_s20   ;;  %s1442_s19 = sphi %s1491_s19, %s2265_s19   ;;  %s1438_s18 = sphi %s1489_s18, %s2264_s18   ;;  %s1434_s17 = sphi %s1487_s17, %s2260_s17   ;;  %s1430_s16 = sphi %s1485_s16, %s2263_s16   ;;  %s1426_s15 = sphi %s1483_s15, %s2262_s15  }
   0xe   : > { %s45_s22 = sadd.s32 1, %s1434_s17  ;;  %p38_p0 = scmp.ge.s32.totalorder %s36_s21, 2 }
   0xf   : > { %p52_p1 = scmp.ne.s32.totalorder %s1434_s17, %s1430_s16  ;;  %p53_p2 = scmp.eq.s32.totalorder %s1446_s20, 0 }
  0x10   : > { %s2267_s21 = smov (%p38_p0, %s36_s21), 0  ;;  %p1166_p5 = scmp.lt.s32.totalorder %s1446_s20, 2 }
  0x11   : > { %2222 = sst [smem:[#allocation16_spill]] %s2267_s21  ;;  %p54_p4 = por %p53_p2, %p52_p1 }
  0x12   : > { %s40_s23 = ssub.s32 %s1442_s19, %s2267_s21  ;;  %s1528_s24 = sand.u32 1, %s1434_s17  }
  0x13   : > { %p43_p6 = scmp.eq.s32.totalorder %s40_s23, 0  ;;  %p1530_p7 = pnand %p1166_p5, %p54_p4 }
  0x14   : > { %s218_s27 = sand.u32 1, %s1446_s20   ;;  %s1126_s28 = smul.u32 72, %s1528_s24 }
  0x15   : > { %s1535_s26 = scalar_select %p43_p6, %s1434_s17, %s45_s22  }
  0x16   : > { %s1127_s29 = smul.u32 1152, %s1442_s19  ;;  %s2225_s1 = sld [smem:[#allocation19_spill]] }
  0x17   : > { %2224 = sst [smem:[#allocation17_spill]] %s1535_s26  ;;  %s222_s7 = scalar_lea.vmem [#allocation6], %s1126_s28 }
  0x18   : > { %s230_s8 = sshll.u32 %s222_s7, 4  ;;  %s1543_s9 = scalar_lea.sflag [#allocation7], %s218_s27  ;;  %s231_s8 = int_to_ptr.vmem [resolvable:$true] %s230_s8 }
  0x19   : > { %p2215_p8 = pneg %p1530_p7  ;;  %s1272_s10 = scalar_lea.vmem %s231_s8, 1152 }
  0x1a   : > { %p1273_p9 = scmp.ne.s32.totalorder %s231_s8, %s1272_s10  ;;  %s1448_s11 = smov [#allocation6]  }
  0x1b   : > { %s1277_s12 = sshll.u32 %s1448_s11, 4  ;;  %s1278_s12 = int_to_ptr.vmem [resolvable:$false] %s1277_s12 }
  0x1c   : > { %s229_s6 = scalar_lea.hbm %s2225_s1, %s1127_s29  ;;  %p1275_p10 = pnand %p1273_p9, %p2215_p8 }
  0x1d   : > { %s1279_s13 = scalar_lea.vmem %s1278_s12, 2304  ;;  %p1280_p12 = scmp.lt.s32.totalorder %s231_s8, %s1278_s12 }
  0x1e   : > { %p1276_p11 = pneg %p1275_p10  ;;  %p1281_p13 = scmp.lt.s32.totalorder %s1279_s13, %s1272_s10 }
  0x20   : > { %p1282_p0 = por %p1281_p13, %p1280_p12 }
  0x22   : > { %p1283_p2 = pnand %p1282_p0, %p1276_p11 }
  0x24   : > { %1286 = shalt.err (!%p1283_p2)
}
  0x25   : > { %s2210_s14 = smov 128   ;;  %s2212_s22 = smov 8  }
  0x26   : > { %1157 = dma.hbm_to_vmem [thread:$0]  (!%p1530_p7), %s229_s6, 1152, %s231_s8, %s1543_s9, %s2210_s14, %s2210_s14, %s2212_s22  }
  0x27   : > { %s1557_s23 = sadd.s32 4294967295, %s1446_s20   ;;  %s1065_s27 = sadd.s32 4294967294, %s1446_s20  }
  0x28   : > { %p58_p4 = scmp.ne.s32.totalorder %s1430_s16, %s1426_s15  ;;  %p2214_p5 = scmp.eq.s32.totalorder %s1557_s23, 0 }
  0x29   : > { %p159_p6 = scmp.eq.s32.totalorder %s1557_s23, 1  ;;  %p165_p9 = scmp.eq.s32.totalorder %s1065_s27, 1 }
  0x2a   : > { %p1066_p10 = scmp.ge.s32.totalorder %s1446_s20, 1  ;;  %p1567_p11 = por %p2214_p5, %p58_p4 }
  0x2b   : > { %p1574_p12 = por %p159_p6, %p52_p1  ;;  %p1578_p13 = por %p165_p9, %p58_p4 }
  0x2c   : > { %p172_p0 = scmp.lt.s32.totalorder %s1446_s20, 3  ;;  %s2229_s3 = sld [smem:[#allocation20_spill]] }
  0x2d   : > { %s2228_s30 = scalar_select %p1578_p13, 1, 0 }
  0x2e   : > { %p1586_p2 = pnand %p1066_p10, %p172_p0  ;;  %s1124_s10 = smul.u32 40, %s1528_s24 }
  0x2f   : > { %s1125_s11 = smul.u32 640, %s1442_s19  ;;  %s2232_s0 = sld [smem:[#allocation18_spill]] }
  0x30   : > { %p1147_p1 = pneg %p1586_p2  ;;  %s200_s6 = scalar_lea.vmem [#allocation2], %s1124_s10 }
  0x31   : > { %s208_s14 = sshll.u32 %s200_s6, 4  ;;  %s1605_s14 = int_to_ptr.vmem [resolvable:$true] %s208_s14 }
  0x32   : > { %s185_s7 = sshll.u32 %s2229_s3, 4  ;;  %p1596_p4 = pnand %p1147_p1, %p2214_p5  ;;  %s186_s7 = int_to_ptr.vmem [resolvable:$true] %s185_s7 }
  0x33   : > { %s1287_s22 = scalar_lea.vmem %s186_s7, 32  ;;  %p1295_p1 = scmp.lt.s32.totalorder %s186_s7, %s186_s7 }
  0x34   : > { %p1288_p6 = scmp.ne.s32.totalorder %s186_s7, %s1287_s22  ;;  %p1289_p9 = pneg %p1596_p4 }
  0x35   : > { %s1603_s5 = scalar_lea.hbm %s2232_s0, %s1125_s11  ;;  %p1296_p3 = scmp.lt.s32.totalorder %s1287_s22, %s1287_s22 }
  0x36   : > { %p1290_p10 = pnand %p1289_p9, %p1288_p6 }
  0x37   : > { %p1297_p5 = por %p1296_p3, %p1295_p1 }
  0x38   : > { %p1291_p0 = pneg %p1290_p10 }
  0x3a   : > { %p1298_p8 = pnand %p1297_p5, %p1291_p0 }
  0x3c   : > { %1301 = shalt.err (!%p1298_p8)
}
  0x3d   : > { %s1451_s1 = smov [#allocation9]   ;;  %s197_s10 = scalar_lea.sflag [#allocation3], %s1528_s24 }
  0x3e   : > { %1150 = dma.vmem_to_smem (!%p1596_p4), %s186_s7, 32, %s1451_s1, [#allocation5]  }
  0x3f   : > { %s1315_s11 = scalar_lea.vmem %s1605_s14, 640  ;;  %p2233_p6 = pneg %p1530_p7 }
  0x40   : > { %p1316_p13 = scmp.ne.s32.totalorder %s1605_s14, %s1315_s11  ;;  %s1452_s22 = smov [#allocation2]  }
  0x41   : > { %s1320_s13 = sshll.u32 %s1452_s22, 4  ;;  %s1321_s13 = int_to_ptr.vmem [resolvable:$false] %s1320_s13 }
  0x42   : > { %p1318_p9 = pnand %p1316_p13, %p2233_p6  ;;  %s1322_s27 = scalar_lea.vmem %s1321_s13, 1280 }
  0x43   : > { %p1323_p3 = scmp.lt.s32.totalorder %s1605_s14, %s1321_s13  ;;  %p1324_p8 = scmp.lt.s32.totalorder %s1322_s27, %s1315_s11 }
  0x44   : > { %p1319_p10 = pneg %p1318_p9 }
  0x45   : > { %p1325_p5 = por %p1324_p8, %p1323_p3 }
  0x47   : > { %p1326_p0 = pnand %p1325_p5, %p1319_p10 }
  0x49   : > { %1329 = shalt.err (!%p1326_p0)
}
  0x4a   : > { %s2234_s12 = smov 8   ;;  %s2235_s1 = smov 128  }
  0x4b   : > { %1154 = dma.hbm_to_vmem [thread:$0]  (!%p1530_p7), %s1603_s5, 640, %s1605_s14, %s197_s10, %s2235_s1, %s2235_s1, %s2234_s12  }
  0x4c   : > { %s1128_s7 = smul.u32 136, %s1528_s24  ;;  %p2236_p4 = pmov %p2233_p6 }
  0x4d   : > { %s1129_s6 = smul.u32 2176, %s1442_s19  ;;  %s1453_s21 = smov [#allocation8]  }
  0x4e   : > { %s244_s13 = scalar_lea.vmem [#allocation8], %s1128_s7  ;;  %s1348_s26 = sshll.u32 %s1453_s21, 4  ;;  %s1349_s26 = int_to_ptr.vmem [resolvable:$false] %s1348_s26 }
  0x4f   : > { %s251_s11 = scalar_lea.hbm %s2207_s2, %s1129_s6  ;;  %s252_s27 = sshll.u32 %s244_s13, 4  ;;  %s253_s27 = int_to_ptr.vmem [resolvable:$true] %s252_s27 }
  0x50   : > { %s1343_s3 = scalar_lea.vmem %s253_s27, 2176  ;;  %s1350_s17 = scalar_lea.vmem %s1349_s26, 4352 }
  0x51   : > { %p1344_p13 = scmp.ne.s32.totalorder %s253_s27, %s1343_s3  ;;  %p1351_p9 = scmp.lt.s32.totalorder %s253_s27, %s1349_s26 }
  0x52   : > { %p1352_p10 = scmp.lt.s32.totalorder %s1350_s17, %s1343_s3 }
  0x53   : > { %p1346_p1 = pnand %p1344_p13, %p2236_p4 }
  0x54   : > { %p1353_p3 = por %p1352_p10, %p1351_p9 }
  0x55   : > { %p1347_p6 = pneg %p1346_p1 }
  0x57   : > { %p1354_p8 = pnand %p1353_p3, %p1347_p6 }
  0x59   : > { %1357 = shalt.err (!%p1354_p8)
}
  0x5a   : > { %1160 = dma.hbm_to_vmem [thread:$0]  (!%p1530_p7), %s251_s11, 2176, %s253_s27, %s1543_s9, %s2235_s1, %s2235_s1, %s2234_s12  }
  0x5b   : > { %264 = sbr.rel (%p1586_p2) target bundleno = 242 (0xf2), region = 36  ;;  %s1642_s0 = sand.u32 (!%p1586_p2), 1, %s1430_s16  }
  0x5c   : > { %s1130_s3 = smul.u32 (!%p1586_p2), 40, %s1642_s0  ;;  %s267_s17 = scalar_lea.sflag (!%p1586_p2), [#allocation3], %s1642_s0 }
  0x5e   : > { %s1646_s21 = scalar_lea.vmem (!%p1586_p2), [#allocation2], %s1130_s3 }
  0x60   : > { %1409 = dma.done.wait (%p1567_p11), %s267_s17, 640  }
  0x61   : > { %1411 = vsyncadd (%p1567_p11), %s267_s17, 4294966656  ;;  %s275_s24 = sand.u32 1, %s1557_s23   ;;  %s1131_s25 = smul.u32 72, %s1642_s0 }
  0x62   : > { %s276_s26 = scalar_lea.sflag [#allocation7], %s275_s24 }
  0x63   : > { %s1654_s9 = scalar_lea.vmem [#allocation6], %s1131_s25 }
  0x64   : > { %1413 = dma.done.wait (%p1567_p11), %s276_s26, 3328  }
  0x65   : > { %1415 = vsyncadd (%p1567_p11), %s276_s26, 4294963968  ;;  %s1132_s14 = smul.u32 136, %s1642_s0  ;;  %p2237_p7 = scmp.eq.s32.totalorder %s1557_s23, 0 }
  0x67   : > { %s1661_s8 = scalar_lea.vmem [#allocation8], %s1132_s14 }
  0x68   : > { %1417 = dma.done.wait (%p2237_p7), [#allocation5], 32   ;;  %p2238_p2 = pmov %p2237_p7 }
  0x6a   : > { %1419 = vsyncadd (%p2238_p2), [#allocation5], 4294967264 }
  0x6b   : > { %297 = sfence }
  0x6c   : > { %v338_v0 = vlaneseq  ;;  %v348_v1 = vld [vmem:[%s1654_s9] sm:$0xff]  ;;  %v1669_v2 = vld [vmem:[%s1654_s9 + $0x10] sm:$0xff]  ;;  %s1672_s28 = sshll.u32 %s1438_s18, 7  ;;  %v1675_v3 = vld [vmem:[%s1654_s9 + $0x18] sm:$0xff] }
  0x6d   : > { %v395_v4 = vmul.f32 0.5, %v1669_v2  ;;  %s1679_s23 = sld [smem:[#allocation9 + %s1672_s28]]  ;;  %s544_s5 = sadd.s32 1, %s1672_s28  ;;  %v1074_v7 = vld [vmem:[%s1654_s9 + $0x8] sm:$0xff]  ;;  %v1087_v8 = vld [vmem:[%s1661_s8 + $0x10] sm:$0xff]  ;;  %v368_v10 = vld [vmem:[%s1661_s8] sm:$0xff]  ;;  %v1698_v20 = vmul.f32 %v1675_v3, %v1669_v2 }
  0x6e   : > { %v339_v5 = vshrl.u32 %v338_v0, 7  ;;  %v341_v6 = vand.u32 127, %v338_v0  ;;  %v1088_v9 = vld [vmem:[%s1661_s8 + $0x18] sm:$0xff]  ;;  %v1086_v11 = vld [vmem:[%s1661_s8 + $0x8] sm:$0xff]  ;;  %v1688_v12 = vld [vmem:[%s1661_s8 + $0x60] sm:$0xff]  ;;  %v397_v14 = vmul.f32 0.5, %v1675_v3 }
  0x6f   : > { %v1690_v13 = vsub.f32 %v348_v1, %v395_v4  ;;  %v1693_v15 = vadd.f32 %v395_v4, %v348_v1  ;;  %v405_v16 = vmul.f32 0.5, %v1087_v8  ;;  %s546_s10 = sadd.s32 2, %s1672_s28  ;;  %v407_v18 = vmul.f32 0.5, %v1088_v9  ;;  %s1700_s12 = sld [smem:[#allocation9 + %s544_s5]]  ;;  %v1704_v21 = vld [vmem:[%s1661_s8 + $0x58] sm:$0xff] }
  0x70   : > { %v345_v17 = vmul.u32 128, %v339_v5  ;;  %v449_v19 = vmul.f32 %v1088_v9, %v1087_v8  ;;  %s548_s1 = sadd.s32 3, %s1672_s28  ;;  %v1706_v22 = vsub.f32 %v1074_v7, %v397_v14  ;;  %v1708_v23 = vadd.f32 %v1074_v7, %v397_v14  ;;  %s1714_s7 = sld [smem:[#allocation9 + %s546_s10]] }
  0x71   : > { %v401_v24 = vmin.f32 %v1690_v13, %v1693_v15  ;;  %v402_v25 = vmax.f32 %v1690_v13, %v1693_v15  ;;  %s550_s6 = sadd.s32 4, %s1672_s28  ;;  %v406_v26 = vsub.f32 %v368_v10, %v405_v16  ;;  %v408_v27 = vsub.f32 %v1086_v11, %v407_v18  ;;  %s1721_s22 = sld [smem:[#allocation9 + %s548_s1]] }
  0x72   : > { %v409_v28 = vadd.f32 %v405_v16, %v368_v10  ;;  %v1719_v29 = vmul.f32 %v1688_v12, %v1704_v21  ;;  %s570_s11 = sadd.s32 5, %s1672_s28  ;;  %v403_v30 = vmin.f32 %v1706_v22, %v1708_v23  ;;  %v404_v31 = vmax.f32 %v1706_v22, %v1708_v23  ;;  %s1728_s13 = sld [smem:[#allocation9 + %s550_s6]] }
  0x73   : > { %v410_v32 = vadd.f32 %v1086_v11, %v407_v18  ;;  %v415_v33 = vsub.f32 %v402_v25, %v401_v24  ;;  %s572_s27 = sadd.s32 6, %s1672_s28  ;;  %v1731_v34 = vadd.s32 %v345_v17, %v341_v6  ;;  %v1733_v37 = vmul.f32 0.00024414063, %v449_v19  ;;  %s1735_s3 = sld [smem:[#allocation9 + %s570_s11]] }
  0x74   : > { %v411_v35 = vmin.f32 %v406_v26, %v409_v28  ;;  %v412_v36 = vmax.f32 %v406_v26, %v409_v28  ;;  %s574_s17 = sadd.s32 7, %s1672_s28  ;;  %v416_v40 = vsub.f32 %v404_v31, %v403_v30  ;;  %v554_v41 = vstv %s1679_s23  ;;  %s1739_s24 = sld [smem:[#allocation9 + %s572_s27]] }
  0x75   : > { %v413_v38 = vmin.f32 %v408_v27, %v410_v32  ;;  %v414_v39 = vmax.f32 %v408_v27, %v410_v32  ;;  %s576_s25 = sadd.s32 8, %s1672_s28  ;;  %s1742_s26 = sld [smem:[#allocation9 + %s574_s17]]  ;;  %v451_v56 = vsub.f32 2.0, %v1733_v37  ;;  %v555_v1 = vmax.f32 %v1690_v13, %v554_v41 }
  0x76   : > { %v418_v42 = vsub.f32 %v412_v36, %v411_v35  ;;  %v421_v43 = vmin.f32 %v402_v25, %v412_v36  ;;  %v422_v44 = vmax.f32 %v401_v24, %v411_v35  ;;  %v435_v45 = vmax.f32 %v402_v25, %v412_v36  ;;  %s578_s14 = sadd.s32 9, %s1672_s28  ;;  %s1745_s5 = sld [smem:[#allocation9 + %s576_s25]] }
  0x77   : > { %v417_v46 = vmul.f32 %v416_v40, %v415_v33  ;;  %v419_v47 = vsub.f32 %v414_v39, %v413_v38  ;;  %v425_v48 = vmin.f32 %v404_v31, %v414_v39  ;;  %v426_v49 = vmax.f32 %v403_v30, %v413_v38  ;;  %s599_s23 = sadd.s32 10, %s1672_s28  ;;  %s1748_s10 = sld [smem:[#allocation9 + %s578_s14]] }
  0x78   : > { %v423_v50 = vsub.f32 %v421_v43, %v422_v44  ;;  %v436_v51 = vmin.f32 %v401_v24, %v411_v35  ;;  %v439_v52 = vmax.f32 %v404_v31, %v414_v39  ;;  %v440_v53 = vmin.f32 %v403_v30, %v413_v38  ;;  %s601_s1 = sadd.s32 11, %s1672_s28  ;;  %s1753_s6 = sld [smem:[#allocation9 + %s599_s23]] }
  0x79   : > { %v420_v54 = vmul.f32 %v419_v47, %v418_v42  ;;  %v427_v55 = vsub.f32 %v425_v48, %v426_v49  ;;  %v552_v57 = vstv %s1714_s7  ;;  %s603_s11 = sadd.s32 12, %s1672_s28  ;;  %s1757_s27 = sld [smem:[#allocation9 + %s601_s1]]  ;;  %v1761_v0 = vmul.f32 %v1719_v29, %v451_v56 }
  0x7a   : > { %v424_v58 = vmax.f32 %v423_v50, 0.0  ;;  %v437_v59 = vsub.f32 %v435_v45, %v436_v51  ;;  %v441_v60 = vsub.f32 %v439_v52, %v440_v53  ;;  %v553_v61 = vmin.f32 %v1693_v15, %v552_v57  ;;  %s605_s17 = sadd.s32 13, %s1672_s28  ;;  %s1764_s7 = sld [smem:[#allocation9 + %s603_s11]] }
  0x7b   : > { %v428_v62 = vmax.f32 %v427_v55, 0.0  ;;  %v430_v63 = vadd.f32 %v420_v54, %v417_v46  ;;  %s607_s25 = sadd.s32 14, %s1672_s28  ;;  %v558_v6 = vstv %s1721_s22  ;;  %v560_v7 = vstv %s1700_s12  ;;  %s1769_s14 = sld [smem:[#allocation9 + %s605_s17]] }
  0x7c   : > { %v438_v4 = vmax.f32 %v437_v59, 0.0  ;;  %v442_v5 = vmax.f32 %v441_v60, 0.0  ;;  %s628_s23 = sadd.s32 15, %s1672_s28  ;;  %v556_v9 = vsub.f32 %v553_v61, %v555_v1  ;;  %v559_v10 = vmin.f32 %v1708_v23, %v558_v6  ;;  %s1776_s1 = sld [smem:[#allocation9 + %s607_s25]] }
  0x7d   : > { %v1772_v8 = vmul.f32 %v428_v62, %v424_v58  ;;  %v561_v11 = vmax.f32 %v1706_v22, %v560_v7  ;;  %s630_s11 = sadd.s32 16, %s1672_s28  ;;  %v566_v16 = vstv %s1728_s13  ;;  %v580_v17 = vstv %s1742_s26  ;;  %s1784_s12 = sld [smem:[#allocation9 + %s628_s23]] }
  0x7e   : > { %v1779_v14 = vmul.f32 %v442_v5, %v438_v4  ;;  %v582_v18 = vstv %s1735_s3  ;;  %s632_s22 = sadd.s32 17, %s1672_s28  ;;  %v557_v24 = vmax.f32 %v556_v9, 0.0  ;;  %v567_v26 = vadd.f32 %v566_v16, %v1698_v20  ;;  %s1791_s17 = sld [smem:[#allocation9 + %s630_s11]] }
  0x7f   : > { %v1788_v19 = vsub.f32 %v430_v63, %v1772_v8  ;;  %v562_v25 = vsub.f32 %v559_v10, %v561_v11  ;;  %s634_s25 = sadd.s32 18, %s1672_s28  ;;  %v581_v28 = vmin.f32 %v1693_v15, %v580_v17  ;;  %v583_v30 = vmax.f32 %v1690_v13, %v582_v18  ;;  %s1798_s13 = sld [smem:[#allocation9 + %s632_s22]] }
  0x80   : > { %v445_v27 = vadd.f32 1e-08, %v1779_v14  ;;  %v586_v31 = vstv %s1745_s5  ;;  %s636_s3 = sadd.s32 19, %s1672_s28  ;;  %v1804_v36 = vmul.f32 0.5, %v567_v26  ;;  %s1806_s26 = sld [smem:[#allocation9 + %s634_s25]]  ;;  %v588_v40 = vstv %s1739_s24 }
  0x81   : > { %v432_v32 = vadd.f32 1e-08, %v1788_v19  ;;  %v444_v33 = vsub.f32 %v1779_v14, %v1788_v19  ;;  %v563_v35 = vmax.f32 %v562_v25, 0.0  ;;  %s657_s23 = sadd.s32 20, %s1672_s28  ;;  %v584_v38 = vsub.f32 %v581_v28, %v583_v30  ;;  %s1811_s5 = sld [smem:[#allocation9 + %s636_s3]] }
  0x82   : > { %1223 = vrcp.f32 %v445_v27  ;;  %v587_v39 = vmin.f32 %v1708_v23, %v586_v31  ;;  %s659_s11 = sadd.s32 21, %s1672_s28  ;;  %v589_v42 = vmax.f32 %v1706_v22, %v588_v40  ;;  %v594_v43 = vstv %s1748_s10  ;;  %s1816_s22 = sld [smem:[#allocation9 + %s657_s23]] }
  0x83   : > { %1225 = vrcp.f32 %v432_v32  ;;  %v564_v41 = vmul.f32 %v563_v35, %v557_v24  ;;  %s661_s25 = sadd.s32 22, %s1672_s28  ;;  %v585_v44 = vmax.f32 %v584_v38, 0.0  ;;  %v595_v45 = vadd.f32 %v594_v43, %v1698_v20  ;;  %s663_s3 = sadd.s32 23, %s1672_s28 }
  0x84   : > { %v609_v46 = vstv %s1764_s7  ;;  %v611_v47 = vstv %s1753_s6  ;;  %s1822_s24 = sld [smem:[#allocation9 + %s661_s25]]  ;;  %v590_v49 = vsub.f32 %v587_v39, %v589_v42  ;;  %s665_s23 = sadd.s32 24, %s1672_s28  ;;  %v615_v53 = vstv %s1769_s14 }
  0x85   : > { %v565_v48 = vmul.f32 1.5, %v564_v41  ;;  %v610_v50 = vmin.f32 %v1693_v15, %v609_v46  ;;  %v612_v51 = vmax.f32 %v1690_v13, %v611_v47  ;;  %s1827_s10 = sld [smem:[#allocation9 + %s659_s11]]  ;;  %v596_v52 = vmul.f32 0.5, %v595_v45  ;;  %s686_s7 = sadd.s32 25, %s1672_s28 }
  0x86   : > { %v617_v54 = vstv %s1757_s27  ;;  %v623_v55 = vstv %s1776_s1  ;;  %s1833_s6 = sld [smem:[#allocation9 + %s663_s3]]  ;;  %v591_v56 = vmax.f32 %v590_v49, 0.0  ;;  %v616_v58 = vmin.f32 %v1708_v23, %v615_v53  ;;  %s688_s25 = sadd.s32 26, %s1672_s28 }
  0x87   : > { %vm569_vm0 = vcmp.lt.f32.partialorder %v565_v48, %v1804_v36  ;;  %v613_v57 = vsub.f32 %v610_v50, %v612_v51  ;;  %s1838_s11 = sld [smem:[#allocation9 + %s665_s23]]  ;;  %v618_v59 = vmax.f32 %v1706_v22, %v617_v54  ;;  %v624_v60 = vadd.f32 %v623_v55, %v1698_v20  ;;  %s690_s14 = sadd.s32 27, %s1672_s28 }
  0x88   : > { %v638_v61 = vstv %s1798_s13  ;;  %v640_v62 = vstv %s1784_s12  ;;  %s1845_s27 = sld [smem:[#allocation9 + %s686_s7]]  ;;  %v592_v63 = vmul.f32 %v591_v56, %v585_v44  ;;  %s692_s3 = sadd.s32 28, %s1672_s28  ;;  %v644_v9 = vstv %s1806_s26 }
  0x89   : > { %v614_v1 = vmax.f32 %v613_v57, 0.0  ;;  %v639_v4 = vmin.f32 %v1693_v15, %v638_v61  ;;  %v641_v5 = vmax.f32 %v1690_v13, %v640_v62  ;;  %s1850_s1 = sld [smem:[#allocation9 + %s690_s14]]  ;;  %v619_v6 = vsub.f32 %v616_v58, %v618_v59  ;;  %s694_s13 = sadd.s32 29, %s1672_s28 }
  0x8a   : > { %v625_v7 = vmul.f32 0.5, %v624_v60  ;;  %v646_v10 = vstv %s1791_s17  ;;  %s1855_s12 = sld [smem:[#allocation9 + %s688_s25]]  ;;  %v593_v11 = vmul.f32 1.5, %v592_v63  ;;  %v645_v17 = vmin.f32 %v1708_v23, %v644_v9  ;;  %s715_s7 = sadd.s32 30, %s1672_s28 }
  0x8b   : > { %v642_v16 = vsub.f32 %v639_v4, %v641_v5  ;;  %v647_v18 = vmax.f32 %v1706_v22, %v646_v10  ;;  %s1860_s23 = sld [smem:[#allocation9 + %s692_s3]]  ;;  %v620_v24 = vmax.f32 %v619_v6, 0.0  ;;  %v652_v25 = vstv %s1811_s5  ;;  %s717_s26 = sadd.s32 31, %s1672_s28  ;;  %v1994_v4 = vld [vmem:[%s1646_s21 + $0x20] sm:$0xff] }
  0x8c   : > { %v667_v26 = vstv %s1822_s24  ;;  %v669_v27 = vstv %s1816_s22  ;;  %s1866_s17 = sld [smem:[#allocation9 + %s694_s13]]  ;;  %vm597_vm1 = vcmp.lt.f32.partialorder %v593_v11, %v596_v52  ;;  %v653_v31 = vadd.f32 %v652_v25, %v1698_v20  ;;  %s719_s14 = sadd.s32 32, %s1672_s28 }
  0x8d   : > { %v643_v28 = vmax.f32 %v642_v16, 0.0  ;;  %v648_v30 = vsub.f32 %v645_v17, %v647_v18  ;;  %s1870_s25 = sld [smem:[#allocation9 + %s715_s7]]  ;;  %vm347_vm2 = vcmp.lt.s32.totalorder %v1731_v34, 192  ;;  %vm1876_vm3 = vmand %vm569_vm0, %vm597_vm1  ;;  %v621_v35 = vmul.f32 %v620_v24, %v614_v1  ;;  %s721_s22 = sadd.s32 33, %s1672_s28 }
  0x8e   : > { %v668_v38 = vmin.f32 %v1693_v15, %v667_v26  ;;  %v670_v39 = vmax.f32 %v1690_v13, %v669_v27  ;;  %v673_v40 = vstv %s1833_s6  ;;  %s1883_s5 = sld [smem:[#allocation9 + %s717_s26]]  ;;  %v654_v43 = vmul.f32 0.5, %v653_v31  ;;  %s723_s3 = sadd.s32 34, %s1672_s28 }
  0x8f   : > { %v1224_v41 = vpop.eup %1223  ;;  %v649_v42 = vmax.f32 %v648_v30, 0.0  ;;  %v674_v36 = vmin.f32 %v1708_v23, %v673_v40  ;;  %v675_v44 = vstv %s1827_s10  ;;  %s1888_s24 = sld [smem:[#allocation9 + %s719_s14]]  ;;  %v622_v47 = vmul.f32 1.5, %v621_v35  ;;  %s744_s13 = sadd.s32 35, %s1672_s28 }
  0x90   : > { %v1226_v45 = vpop.eup %1225  ;;  %v447_v46 = vmul.f32 %v1224_v41, %v444_v33  ;;  %v671_v48 = vsub.f32 %v668_v38, %v670_v39  ;;  %v676_v49 = vmax.f32 %v1706_v22, %v675_v44  ;;  %s1895_s6 = sld [smem:[#allocation9 + %s721_s22]]  ;;  %v681_v52 = vstv %s1838_s11  ;;  %s746_s7 = sadd.s32 36, %s1672_s28 }
  0x91   : > { %v434_v50 = vmul.f32 %v1226_v45, %v1772_v8  ;;  %v650_v51 = vmul.f32 %v649_v42, %v643_v28  ;;  %v696_v53 = vstv %s1850_s1  ;;  %s1901_s10 = sld [smem:[#allocation9 + %s723_s3]]  ;;  %vm626_vm4 = vcmp.lt.f32.partialorder %v622_v47, %v625_v7  ;;  %s748_s14 = sadd.s32 37, %s1672_s28 }
  0x92   : > { %v672_v14 = vmax.f32 %v671_v48, 0.0  ;;  %v677_v19 = vsub.f32 %v674_v36, %v676_v49  ;;  %v682_v33 = vadd.f32 %v681_v52, %v1698_v20  ;;  %s1905_s26 = sld [smem:[#allocation9 + %s744_s13]]  ;;  %vm1910_vm5 = vmand %vm1876_vm3, %vm626_vm4  ;;  %v697_v56 = vmin.f32 %v1693_v15, %v696_v53  ;;  %s750_s1 = sadd.s32 38, %s1672_s28  ;;  %v1970_v48 = vld [vmem:[%s1646_s21] sm:$0xff] }
  0x93   : > { %v448_v8 = vsub.f32 %v434_v50, %v447_v46  ;;  %v651_v55 = vmul.f32 1.5, %v650_v51  ;;  %v698_v57 = vstv %s1845_s27  ;;  %s1916_s11 = sld [smem:[#allocation9 + %s748_s14]]  ;;  %v702_v61 = vstv %s1860_s23  ;;  %s752_s3 = sadd.s32 39, %s1672_s28 }
  0x94   : > { %v678_v58 = vmax.f32 %v677_v19, 0.0  ;;  %v683_v59 = vmul.f32 0.5, %v682_v33  ;;  %v699_v60 = vmax.f32 %v1690_v13, %v698_v57  ;;  %s1921_s22 = sld [smem:[#allocation9 + %s746_s7]]  ;;  %s1133_s13 = smul.u32 48, %s1642_s0  ;;  %v703_v63 = vmin.f32 %v1708_v23, %v702_v61 }
  0x95   : > { %v454_v62 = vsub.f32 1.0, %v448_v8  ;;  %vm655_vm6 = vcmp.lt.f32.partialorder %v651_v55, %v654_v43  ;;  %v704_v1 = vstv %s1855_s12  ;;  %s1927_s27 = sld [smem:[#allocation9 + %s750_s1]]  ;;  %v710_v9 = vstv %s1866_s17  ;;  %v1081_v8 = vld [vmem:[%s1654_s9 + $0x40] sm:$0xff] }
  0x96   : > { %vm1931_vm7 = vmand %vm1910_vm5, %vm655_vm6  ;;  %v679_v5 = vmul.f32 %v678_v58, %v672_v14  ;;  %v700_v6 = vsub.f32 %v697_v56, %v699_v60  ;;  %v705_v7 = vmax.f32 %v1706_v22, %v704_v1  ;;  %v711_v11 = vadd.f32 %v710_v9, %v1698_v20  ;;  %s1941_s28 = sld [smem:[#allocation9 + %s752_s3]]  ;;  %s1960_s12 = scalar_lea.vmem [#allocation10], %s1133_s13  ;;  %v1988_v1 = vld [vmem:[%s1646_s21 + $0x10] sm:$0xff]  ;;  %v1090_v9 = vld [vmem:[%s1661_s8 + $0x28] sm:$0xff] }
  0x97   : > { %v455_v10 = vmul.f32 %v454_v62, %v1761_v0  ;;  %v725_v16 = vstv %s1888_s24  ;;  %v727_v17 = vstv %s1870_s25  ;;  %v731_v28 = vstv %s1895_s6  ;;  %s909_s25 = scalar_lea.sflag [#allocation4], %s1642_s0 }
  0x98   : > { %v680_v18 = vmul.f32 1.5, %v679_v5  ;;  %v701_v24 = vmax.f32 %v700_v6, 0.0  ;;  %v706_v25 = vsub.f32 %v703_v63, %v705_v7  ;;  %v726_v26 = vmin.f32 %v1693_v15, %v725_v16  ;;  %v1089_v7 = vld [vmem:[%s1661_s8 + $0x20] sm:$0xff]  ;;  %v1091_v16 = vld [vmem:[%s1661_s8 + $0x30] sm:$0xff] }
  0x99   : > { %v880_v27 = vsel %vm347_vm2, %v455_v10, 0.0  ;;  %v728_v0 = vmax.f32 %v1690_v13, %v727_v17  ;;  %v732_v31 = vmin.f32 %v1708_v23, %v731_v28  ;;  %v733_v38 = vstv %s1883_s5 }
  0x9a   : > { %vm684_vm8 = vcmp.lt.f32.partialorder %v680_v18, %v683_v59  ;;  %v707_v30 = vmax.f32 %v706_v25, 0.0  ;;  %v739_v39 = vstv %s1901_s10  ;;  %v754_v40 = vstv %s1916_s11  ;;  %882 = vst [vmem:[%s1960_s12] sm:$0xff] %v880_v27  ;;  %v1985_v59 = vld [vmem:[%s1646_s21 + $0x8] sm:$0xff] }
  0x9b   : > { %vm1951_vm9 = vmand %vm1931_vm7, %vm684_vm8  ;;  %v729_v35 = vsub.f32 %v726_v26, %v728_v0  ;;  %v712_v42 = vmul.f32 0.5, %v711_v11  ;;  %v734_v43 = vmax.f32 %v1706_v22, %v733_v38  ;;  %v755_v36 = vmin.f32 %v1693_v15, %v754_v40  ;;  %v1078_v25 = vld [vmem:[%s1654_s9 + $0x28] sm:$0xff] }
  0x9c   : > { %v708_v41 = vmul.f32 %v707_v30, %v701_v24  ;;  %v740_v44 = vadd.f32 %v739_v39, %v1698_v20  ;;  %v756_v45 = vstv %s1905_s26  ;;  %v760_v46 = vstv %s1927_s27  ;;  %v1077_v24 = vld [vmem:[%s1654_s9 + $0x20] sm:$0xff]  ;;  %v1092_v26 = vld [vmem:[%s1661_s8 + $0x38] sm:$0xff] }
  0x9d   : > { %v762_v47 = vstv %s1921_s22  ;;  %v730_v50 = vmax.f32 %v729_v35, 0.0  ;;  %v735_v51 = vsub.f32 %v732_v31, %v734_v43  ;;  %v757_v52 = vmax.f32 %v1690_v13, %v756_v45  ;;  %v1079_v30 = vld [vmem:[%s1654_s9 + $0x30] sm:$0xff]  ;;  %v1080_v39 = vld [vmem:[%s1654_s9 + $0x38] sm:$0xff] }
  0x9e   : > { %v709_v49 = vmul.f32 1.5, %v708_v41  ;;  %v761_v53 = vmin.f32 %v1708_v23, %v760_v46  ;;  %v763_v14 = vmax.f32 %v1706_v22, %v762_v47  ;;  %v768_v19 = vstv %s1941_s28 }
  0x9f   : > { %v736_v15 = vmax.f32 %v735_v51, 0.0  ;;  %v758_v33 = vsub.f32 %v755_v36, %v757_v52  ;;  %v769_v13 = vadd.f32 %v768_v19, %v1698_v20  ;;  %v777_v23 = vand.u32 2147483647, %v1970_v48  ;;  %v1991_v20 = vld [vmem:[%s1646_s21 + $0x18] sm:$0xff]  ;;  %s1134_s21 = smul.u32 768, %s1438_s18  ;;  %s1455_s18 = smov [#allocation10]  }
  0xa0   : > { %vm713_vm10 = vcmp.lt.f32.partialorder %v709_v49, %v712_v42  ;;  %v764_v54 = vsub.f32 %v761_v53, %v763_v14  ;;  %v741_v22 = vmul.f32 0.5, %v740_v44  ;;  %v819_v5 = vand.u32 2147483647, %v1985_v59  ;;  %s1362_s24 = sshll.u32 %s1455_s18, 4  ;;  %s1363_s24 = int_to_ptr.vmem [resolvable:$false] %s1362_s24 }
  0xa1   : > { %vm1978_vm11 = vmand %vm1951_vm9, %vm713_vm10  ;;  %v737_v55 = vmul.f32 %v736_v15, %v730_v50  ;;  %v759_v56 = vmax.f32 %v758_v33, 0.0  ;;  %v778_v58 = vsub.f32 0.0, %v777_v23  ;;  %v770_v62 = vmul.f32 0.5, %v769_v13  ;;  %s2156_s17 = scalar_lea.hbm %s2209_s4, %s1134_s21  ;;  %s1364_s6 = scalar_lea.vmem %s1363_s24, 1536 }
  0xa2   : > { %v765_v57 = vmax.f32 %v764_v54, 0.0  ;;  %v820_v10 = vand.u32 2147483647, %v1988_v1  ;;  %v821_v11 = vand.u32 2147483647, %v1991_v20  ;;  %v823_v18 = vsub.f32 0.0, %v819_v5 }
  0xa3   : > { %v738_v60 = vmul.f32 1.5, %v737_v55  ;;  %v779_v63 = vmul.f32 1.442695, %v778_v58  ;;  %v822_v17 = vand.u32 2147483647, %v1994_v4  ;;  %v466_v31 = vsub.f32 %v1077_v24, %v1089_v7  ;;  %v1093_v54 = vld [vmem:[%s1661_s8 + $0x40] sm:$0xff] }
  0xa4   : > { %v766_v61 = vmul.f32 %v765_v57, %v759_v56  ;;  %v824_v0 = vsub.f32 0.0, %v820_v10  ;;  %v825_v28 = vsub.f32 0.0, %v821_v11  ;;  %v467_v32 = vsub.f32 %v1078_v25, %v1090_v9 }
  0xa5   : > { %vm742_vm12 = vcmp.lt.f32.partialorder %v738_v60, %v741_v22  ;;  %1227 = vpow2.f32 %v779_v63  ;;  %v826_v35 = vsub.f32 0.0, %v822_v17  ;;  %v827_v38 = vmul.f32 1.442695, %v823_v18 }
  0xa6   : > { %vm743_vm13 = vmand %vm1978_vm11, %vm742_vm12  ;;  %v767_v6 = vmul.f32 1.5, %v766_v61  ;;  %v468_v40 = vsub.f32 %v1079_v30, %v1091_v16  ;;  %v829_v41 = vmul.f32 1.442695, %v824_v0  ;;  %v831_v42 = vmul.f32 1.442695, %v825_v28  ;;  %v1099_v16 = vld [vmem:[%s1661_s8 + $0x70] sm:$0xff] }
  0xa7   : > { %v469_v43 = vsub.f32 %v1080_v39, %v1092_v26  ;;  %v2016_v36 = vmul.f32 %v1669_v2, %v1669_v2  ;;  %1229 = vpow2.f32 %v827_v38  ;;  %v833_v44 = vmul.f32 1.442695, %v826_v35  ;;  %v1101_v35 = vld [vmem:[%s1661_s8 + $0x80] sm:$0xff] }
  0xa8   : > { %vm771_vm14 = vcmp.lt.f32.partialorder %v767_v6, %v770_v62  ;;  %v470_v45 = vand.u32 2147483647, %v466_v31  ;;  %v471_v46 = vand.u32 2147483647, %v467_v32  ;;  %v781_v47 = vmax.f32 %v1970_v48, 0.0  ;;  %v1098_v62 = vld [vmem:[%s1661_s8 + $0x68] sm:$0xff] }
  0xa9   : > { %vm2008_vm15 = vmand %vm743_vm13, %vm771_vm14  ;;  %1231 = vpow2.f32 %v829_v41  ;;  %v472_v49 = vand.u32 2147483647, %v468_v40  ;;  %v473_v50 = vand.u32 2147483647, %v469_v43  ;;  %v782_v51 = vmul.f32 %v1704_v21, %v1970_v48 }
  0xaa   : > { %1233 = vpow2.f32 %v831_v42  ;;  %vm474_vm0 = vcmp.lt.f32.partialorder %v470_v45, 0.11111111  ;;  %v478_v52 = vmul.f32 4.5, %v470_v45  ;;  %vm475_vm1 = vcmp.lt.f32.partialorder %v471_v46, 0.11111111 }
  0xab   : > { %1235 = vpow2.f32 %v833_v44  ;;  %vm476_vm3 = vcmp.lt.f32.partialorder %v472_v49, 0.11111111  ;;  %v479_v53 = vmul.f32 4.5, %v471_v46  ;;  %v480_v14 = vmul.f32 4.5, %v472_v49 }
  0xac   : > { %v481_v19 = vmul.f32 4.5, %v473_v50  ;;  %v482_v15 = vmul.f32 %v478_v52, %v470_v45  ;;  %v1103_v33 = vadd.f32 -0.055555556, %v470_v45  ;;  %v1104_v23 = vadd.f32 -0.055555556, %v471_v46 }
  0xad   : > { %v483_v13 = vmul.f32 %v479_v53, %v471_v46  ;;  %v1105_v55 = vadd.f32 -0.055555556, %v472_v49  ;;  %v1106_v22 = vadd.f32 -0.055555556, %v473_v50  ;;  %v484_v56 = vmul.f32 %v480_v14, %v472_v49 }
  0xae   : > { %v485_v57 = vmul.f32 %v481_v19, %v473_v50  ;;  %v490_v58 = vsel %vm474_vm0, %v482_v15, %v1103_v33  ;;  %v499_v60 = vsub.f32 1.0, %v1077_v24  ;;  %vm477_vm4 = vcmp.lt.f32.partialorder %v473_v50, 0.11111111 }
  0xaf   : > { %v491_v63 = vsel %vm475_vm1, %v483_v13, %v1104_v23  ;;  %v509_v5 = vsub.f32 1.0, %v1078_v25  ;;  %v456_v6 = vsub.f32 %v1081_v8, %v1093_v54  ;;  %v773_v7 = vsub.f32 1.0, %v1704_v21  ;;  %v1100_v25 = vld [vmem:[%s1661_s8 + $0x78] sm:$0xff] }
  0xb0   : > { %v492_v10 = vsel %vm476_vm3, %v484_v56, %v1105_v55  ;;  %v2033_v11 = vmul.f32 %v1675_v3, %v1675_v3  ;;  %v807_v17 = vmax.f32 %v1985_v59, 0.0  ;;  %v494_v18 = vadd.f32 %v491_v63, %v490_v58 }
  0xb1   : > { %v500_v24 = vsub.f32 %v499_v60, %v1079_v30  ;;  %v510_v26 = vsub.f32 %v509_v5, %v1080_v39  ;;  %v811_v0 = vmul.f32 %v1098_v62, %v1985_v59  ;;  %v493_v28 = vsel %vm477_vm4, %v485_v57, %v1106_v22 }
  0xb2   : > { %v2024_v61 = vpop.eup %1227  ;;  %v457_v31 = vand.u32 2147483647, %v456_v6  ;;  %v2040_v32 = vsub.f32 %v781_v47, %v782_v51  ;;  %v808_v38 = vmax.f32 %v1988_v1, 0.0  ;;  %v495_v40 = vadd.f32 %v494_v18, %v492_v10 }
  0xb3   : > { %v784_v9 = vadd.f32 1.0, %v2024_v61  ;;  %v809_v41 = vmax.f32 %v1991_v20, 0.0  ;;  %v810_v42 = vmax.f32 %v1994_v4, 0.0  ;;  %v812_v30 = vmul.f32 %v1099_v16, %v1988_v1 }
  0xb4   : > { %v501_v39 = vand.u32 2147483647, %v500_v24  ;;  %v2047_v43 = vpop.eup %1229  ;;  %v787_v59 = vmul.f32 -0.5, %v2024_v61  ;;  %v813_v44 = vmul.f32 %v1100_v25, %v1991_v20  ;;  %v496_v45 = vadd.f32 %v495_v40, %v493_v28 }
  0xb5   : > { %1237 = vlog2.f32 %v784_v9  ;;  %v511_v46 = vand.u32 2147483647, %v510_v26  ;;  %v2054_v49 = vmul.f32 %v1101_v35, %v1994_v4  ;;  %v2056_v50 = vsub.f32 %v807_v17, %v811_v0  ;;  %v2094_v0 = vld [vmem:[%s1661_s8 + $0x48] sm:$0xff] }
  0xb6   : > { %1239 = vrcp.f32 %v784_v9  ;;  %v2051_v47 = vpop.eup %1231  ;;  %v835_v51 = vadd.f32 1.0, %v2047_v43  ;;  %v459_v52 = vmul.f32 4.5, %v457_v31  ;;  %v1454_v53 = vmov 0.0  }
  0xb7   : > { %v2059_v1 = vpop.eup %1233  ;;  %v1110_v14 = vsel %vm2008_vm15, 1.0, %v1454_v53  ;;  %v790_v20 = vand.u32 2147483647, %v2024_v61  ;;  %v844_v19 = vadd.f32 1.0, %v2051_v47  ;;  %v465_v15 = vadd.f32 1.0, %v1733_v37 }
  0xb8   : > { %v2066_v33 = vpop.eup %1235  ;;  %vm797_vm5 = vcmp.ge.f32.partialorder %v1970_v48, 0.0  ;;  %1241 = vlog2.f32 %v835_v51  ;;  %v853_v8 = vadd.f32 1.0, %v2059_v1  ;;  %v497_v54 = vmul.f32 %v496_v45, %v1719_v29 }
  0xb9   : > { %v502_v13 = vmul.f32 %v1669_v2, %v501_v39  ;;  %v788_v23 = vadd.f32 1.0, %v787_v59  ;;  %v2072_v27 = vsub.f32 %v808_v38, %v812_v30  ;;  %1243 = vlog2.f32 %v844_v19 }
  0xba   : > { %v512_v55 = vmul.f32 %v1675_v3, %v511_v46  ;;  %1245 = vlog2.f32 %v853_v8  ;;  %v862_v37 = vadd.f32 1.0, %v2066_v33  ;;  %v460_v22 = vmul.f32 %v459_v52, %v457_v31 }
  0xbb   : > { %v1102_v56 = vadd.f32 -0.055555556, %v457_v31  ;;  %v776_v57 = vmul.f32 %v1110_v14, %v773_v7  ;;  %vm2076_vm6 = vcmp.lt.f32.partialorder %v790_v20, 0.0004427343  ;;  %v2080_v60 = vsub.f32 %v809_v41, %v813_v44  ;;  %v1095_v14 = vld [vmem:[%s1661_s8 + $0x50] sm:$0xff] }
  0xbc   : > { %vm458_vm7 = vcmp.lt.f32.partialorder %v457_v31, 0.11111111  ;;  %v838_v2 = vmul.f32 -0.5, %v2047_v43  ;;  %1247 = vlog2.f32 %v862_v37  ;;  %v498_v62 = vmul.f32 %v497_v54, %v465_v15 }
  0xbd   : > { %v503_v63 = vmul.f32 %v502_v13, %v502_v13  ;;  %v789_v3 = vmul.f32 %v2024_v61, %v788_v23  ;;  %v841_v5 = vand.u32 2147483647, %v2047_v43  ;;  %v847_v6 = vmul.f32 -0.5, %v2051_v47 }
  0xbe   : > { %v513_v7 = vmul.f32 %v512_v55, %v512_v55  ;;  %v856_v9 = vmul.f32 -0.5, %v2059_v1  ;;  %v895_v16 = vsel %vm347_vm2, %v498_v62, 0.0  ;;  %v462_v17 = vsel %vm458_vm7, %v460_v22, %v1102_v56 }
  0xbf   : > { %v505_v10 = vadd.f32 %v2033_v11, %v503_v63  ;;  %v850_v24 = vand.u32 2147483647, %v2051_v47  ;;  %v463_v25 = vmul.f32 %v462_v17, %v1719_v29  ;;  %v839_v35 = vadd.f32 1.0, %v838_v2  ;;  %1116 = vst [vmem:[%s1960_s12 + $0x18] sm:$0xff] %v895_v16 }
  0xc0   : > { %v515_v26 = vadd.f32 %v2016_v36, %v513_v7  ;;  %v865_v38 = vmul.f32 -0.5, %v2066_v33  ;;  %v848_v41 = vadd.f32 1.0, %v847_v6  ;;  %v857_v59 = vadd.f32 1.0, %v856_v9 }
  0xc1   : > { %v506_v11 = vadd.f32 1e-08, %v505_v10  ;;  %v464_v39 = vmul.f32 16.0, %v463_v25  ;;  %v859_v36 = vand.u32 2147483647, %v2059_v1  ;;  %v840_v52 = vmul.f32 %v2047_v43, %v839_v35 }
  0xc2   : > { %v1238_v18 = vpop.eup %1237  ;;  %v516_v30 = vadd.f32 1e-08, %v515_v26  ;;  %v526_v44 = vadd.f32 1e-08, %v2094_v0  ;;  %v866_v53 = vadd.f32 1.0, %v865_v38  ;;  %v849_v15 = vmul.f32 %v2051_v47, %v848_v41 }
  0xc3   : > { %v1240_v28 = vpop.eup %1239  ;;  %v786_v31 = vmul.f32 0.6931472, %v1238_v18  ;;  %1249 = vrsqrt.f32 %v506_v11  ;;  %vm2110_vm8 = vcmp.lt.f32.partialorder %v841_v5, 0.0004427343  ;;  %vm2115_vm9 = vcmp.lt.f32.partialorder %v850_v24, 0.0004427343 }
  0xc4   : > { %v798_v40 = vmul.f32 %v1240_v28, %v2024_v61  ;;  %1251 = vrsqrt.f32 %v516_v30  ;;  %v900_v61 = vsel %vm347_vm2, %v464_v39, 0.0  ;;  %v868_v8 = vand.u32 2147483647, %v2066_v33  ;;  %v1257_v24 = vld [vmem:[%s1654_s9 + $0x18] sm:$0xff] }
  0xc5   : > { %v792_v45 = vsel %vm2076_vm6, %v789_v3, %v786_v31  ;;  %v1242_v20 = vpop.eup %1241  ;;  %v858_v55 = vmul.f32 %v2059_v1, %v857_v59  ;;  %1118 = vst [vmem:[%s1960_s12 + $0x20] sm:$0xff] %v900_v61  ;;  %v804_v22 = vadd.f32 %v1704_v21, %v776_v57  ;;  %vm860_vm10 = vcmp.lt.f32.partialorder %v859_v36, 0.0004427343 }
  0xc6   : > { %v799_v46 = vsel %vm797_vm5, %v1240_v28, %v798_v40  ;;  %v1244_v54 = vpop.eup %1243  ;;  %v793_v13 = vadd.f32 %v792_v45, %v2040_v32  ;;  %v837_v43 = vmul.f32 0.6931472, %v1242_v20  ;;  %v536_v47 = vadd.f32 1e-08, %v1095_v14 }
  0xc7   : > { %v800_v51 = vsub.f32 %v1704_v21, %v799_v46  ;;  %v1246_v37 = vpop.eup %1245  ;;  %v846_v56 = vmul.f32 0.6931472, %v1244_v54  ;;  %v867_v63 = vmul.f32 %v2066_v33, %v866_v53  ;;  %v818_v32 = vsub.f32 %v810_v42, %v2054_v49 }
  0xc8   : > { %v843_v2 = vsel %vm2110_vm8, %v840_v52, %v837_v43  ;;  %v855_v62 = vmul.f32 0.6931472, %v1246_v37  ;;  %vm869_vm11 = vcmp.lt.f32.partialorder %v868_v8, 0.0004427343  ;;  %1253 = vrcp.f32 %v526_v44 }
  0xc9   : > { %v801_v23 = vand.u32 2147483647, %v800_v51  ;;  %v1248_v3 = vpop.eup %1247  ;;  %v852_v1 = vsel %vm2115_vm9, %v849_v15, %v846_v56  ;;  %v871_v21 = vadd.f32 %v843_v2, %v2056_v50  ;;  %1255 = vrcp.f32 %v536_v47 }
  0xca   : > { %v861_v5 = vsel %vm860_vm10, %v858_v55, %v855_v62  ;;  %v864_v6 = vmul.f32 0.6931472, %v1248_v3  ;;  %v872_v7 = vadd.f32 %v852_v1, %v2072_v27 }
  0xcb   : > { %v802_v58 = vmul.f32 %v801_v23, %v801_v23  ;;  %v873_v33 = vadd.f32 %v861_v5, %v2080_v60  ;;  %v1258_v60 = vld [vmem:[%s1654_s9 + $0x10] sm:$0xff]  ;;  %s922_s9 = sshll.u32 %s1960_s12, 4  ;;  %s2151_s9 = int_to_ptr.vmem [resolvable:$true] %s922_s9 }
  0xcc   : > { %v870_v10 = vsel %vm869_vm11, %v867_v63, %v864_v6  ;;  %v875_v4 = vadd.f32 %v872_v7, %v871_v21  ;;  %s1358_s5 = scalar_lea.vmem %s2151_s9, 768  ;;  %p1365_p13 = scmp.lt.s32.totalorder %s2151_s9, %s1363_s24 }
  0xcd   : > { %v803_v57 = vmul.f32 %v802_v58, %v793_v13  ;;  %v874_v42 = vadd.f32 %v870_v10, %v818_v32  ;;  %p1359_p11 = scmp.ne.s32.totalorder %s2151_s9, %s1358_s5  ;;  %p1366_p4 = scmp.lt.s32.totalorder %s1364_s6, %s1358_s5 }
  0xce   : > { %v876_v16 = vadd.f32 %v875_v4, %v873_v33 }
  0xcf   : > { %v805_v9 = vmul.f32 %v804_v22, %v803_v57  ;;  %p1360_p5 = pnand %p1359_p11, %p1574_p12  ;;  %p1367_p1 = por %p1366_p4, %p1365_p13 }
  0xd0   : > { %v1250_v50 = vpop.eup %1249  ;;  %v877_v27 = vadd.f32 %v876_v16, %v874_v42 }
  0xd1   : > { %v806_v49 = vmul.f32 %v1688_v12, %v805_v9  ;;  %v1252_v17 = vpop.eup %1251  ;;  %v508_v26 = vmul.f32 %v1257_v24, %v1250_v50  ;;  %p1361_p0 = pneg %p1360_p5 }
  0xd2   : > { %v518_v25 = vmul.f32 %v1258_v60, %v1252_v17  ;;  %v878_v28 = vmul.f32 %v877_v27, %v1719_v29 }
  0xd3   : > { %v885_v18 = vsel %vm347_vm2, %v806_v49, 0.0  ;;  %v519_v31 = vsub.f32 %v508_v26, %v2094_v0  ;;  %p1368_p6 = pnand %p1367_p1, %p1361_p0 }
  0xd4   : > { %1112 = vst [vmem:[%s1960_s12 + $0x8] sm:$0xff] %v885_v18  ;;  %v529_v35 = vsub.f32 %v518_v25, %v1095_v14  ;;  %v890_v12 = vsel %vm347_vm2, %v878_v28, 0.0 }
  0xd5   : > { %v520_v38 = vand.u32 2147483647, %v519_v31  ;;  %1114 = vst [vmem:[%s1960_s12 + $0x10] sm:$0xff] %v890_v12  ;;  %v1254_v59 = vpop.eup %1253 }
  0xd6   : > { %v530_v11 = vand.u32 2147483647, %v529_v35  ;;  %v1256_v0 = vpop.eup %1255 }
  0xd7   : > { %v522_v40 = vmul.f32 4.5, %v520_v38  ;;  %v1107_v41 = vadd.f32 -0.055555556, %v520_v38  ;;  %vm521_vm12 = vcmp.lt.f32.partialorder %v520_v38, 0.11111111 }
  0xd8   : > { %v532_v30 = vmul.f32 4.5, %v530_v11  ;;  %v1108_v39 = vadd.f32 -0.055555556, %v530_v11  ;;  %vm531_vm13 = vcmp.lt.f32.partialorder %v530_v11, 0.11111111 }
  0xd9   : > { %v523_v36 = vmul.f32 %v522_v40, %v520_v38 }
  0xda   : > { %v533_v44 = vmul.f32 %v532_v30, %v530_v11 }
  0xdb   : > { %v525_v45 = vsel %vm521_vm12, %v523_v36, %v1107_v41 }
  0xdc   : > { %v528_v46 = vmul.f32 %v1254_v59, %v525_v45  ;;  %v535_v61 = vsel %vm531_vm13, %v533_v44, %v1108_v39 }
  0xdd   : > { %v538_v51 = vmul.f32 %v1256_v0, %v535_v61 }
  0xdf   : > { %v539_v52 = vadd.f32 %v538_v51, %v528_v46 }
  0xe1   : > { %v540_v53 = vmul.f32 %v539_v52, %v1719_v29 }
  0xe3   : > { %v905_v14 = vsel %vm347_vm2, %v540_v53, 0.0 }
  0xe4   : > { %1120 = vst [vmem:[%s1960_s12 + $0x28] sm:$0xff] %v905_v14 }
  0xe5   : > { %1371 = shalt.err (!%p1368_p6)
}
  0xe6   : > { %s1372_s10 = scalar_lea.hbm %s2156_s17, 768  ;;  %s1376_s14 = scalar_lea.hbm %s2209_s4, 1536 }
  0xe7   : > { %p1373_p9 = scmp.ne.s32.totalorder %s2156_s17, %s1372_s10  ;;  %p1377_p8 = scmp.lt.s32.totalorder %s2156_s17, %s2209_s4 }
  0xe8   : > { %p1378_p7 = scmp.lt.s32.totalorder %s1376_s14, %s1372_s10 }
  0xe9   : > { %p1374_p10 = pnand %p1373_p9, %p1574_p12 }
  0xea   : > { %p1379_p2 = por %p1378_p7, %p1377_p8 }
  0xeb   : > { %p1375_p3 = pneg %p1374_p10 }
  0xed   : > { %p1380_p11 = pnand %p1379_p2, %p1375_p3 }
  0xef   : > { %1383 = shalt.err (!%p1380_p11)
}
  0xf0   : > { %s1456_s22 = smov 128   ;;  %s1457_s3 = smov 8  }
  0xf1   : > { %1145 = dma.vmem_to_hbm [thread:$0]  (%p1574_p12), %s2151_s9, 768, %s2156_s17, %s909_s25, %s1456_s22, %s1456_s22, %s1457_s3  }
  0xf2 PF: > { %s937_s13 = sand.u32 1, %s1426_s15   ;;  %p2257_p5 = scmp.ne.s32.totalorder %s2228_s30, 0 }
  0xf3   : > { %p2258_p0 = scmp.ge.s32.totalorder %s1446_s20, 2  ;;  %s938_s27 = scalar_lea.sflag [#allocation4], %s937_s13 }
  0xf5   : > { %p1162_p13 = pnand %p2258_p0, %p2257_p5 }
  0xf7   : > { %p1163_p4 = pneg %p1162_p13 }
  0xf9   : > { %1421 = dma.done.wait (%p1163_p4), %s938_s27, 768  }
  0xfa   : > { %1423 = vsyncadd (%p1163_p4), %s938_s27, 4294966528  ;;  %s24_s20 = sadd.s32 1, %s1446_s20   ;;  %s2259_s28 = sld [smem:[#allocation15_spill]] }
  0xfb   : > { %p21_p1 = scmp.ge.s32.totalorder %s24_s20, 4   ;;  %s2260_s17 = sld [smem:[#allocation17_spill]] }
  0xfc   : > { %s2261_s29 = sld [smem:[#allocation16_spill]]  ;;  %s2262_s15 = smov %s1430_s16 }
  0xfd   : > { %s2264_s18 = smov %s1442_s19 }
  0xfe   :  { %23 = sbr.rel (!%p21_p1) target bundleno = 13 (0xd), region = 135 }
 0x100   : > { %s2263_s16 = smov %s2259_s28 }
 0x102   : > { %s2265_s19 = smov %s2261_s29 }
 0x103   :  { %943 = vsyncpa [#allocation3], 1 }
 0x104   :  { %945 = vsyncpa [#allocation3 + $0x1], 1 }
 0x105   :  { %946 = vsyncpa [#allocation7], 1 }
 0x106   :  { %948 = vsyncpa [#allocation7 + $0x1], 1 }
 0x107   :  { %949 = vsyncpa [#allocation4], 1 }
 0x108   :  { %951 = vsyncpa [#allocation4 + $0x1], 1 }
 0x109   :  { %952 = vsyncpa [#allocation5], 1 }
 0x10a   :  { %954 = vsyncpa [#allocation5 + $0x1], 1 }

</bundles_post_ra>
